<compile_context>
chip_gen: v6e
topology: v6e:2x2x1
jax: 0.10.0
libtpu: 0.0.40
codegen_flags: <defaults>
</compile_context>

<pallas_src>
import functools

import numpy as np
import jax
import jax.numpy as jnp
from jax import lax
from jax.experimental import pallas as pl
from jax.experimental.pallas import tpu as pltpu

NEG_INF = -1e9  # kills cross-window scores in the dense block-diagonal form


# --------------------------- Pallas kernel -----------------------------------
def _window_attention_kernel(x_ref, wqkv_ref, bqkv_ref, wproj_ref, bproj_ref,
                             addm_ref, out_ref, attn_ref, *, num_heads, head_dim):
    C = num_heads * head_dim
    L = x_ref.shape[1]                                            # wps * N rows

    x = x_ref[0].astype(jnp.float32)                              # (L, C)

    # fused qkv projection at M = L rows (qk scale already folded into weights)
    qkv = jnp.dot(x, wqkv_ref[...],
                  preferred_element_type=jnp.float32) + bqkv_ref[...]   # (L, 3C)

    acc = jnp.zeros((L, C), jnp.float32)
    for h in range(num_heads):                                    # static unroll
        q = qkv[:, h * head_dim:(h + 1) * head_dim]               # (L, D)
        k = qkv[:, C + h * head_dim: C + (h + 1) * head_dim]      # (L, D)
        v = qkv[:, 2 * C + h * head_dim: 2 * C + (h + 1) * head_dim]

        # scores over the whole group; contract over D directly (no k.T op)
        s = lax.dot_general(q, k, (((1,), (1,)), ((), ())),
                            preferred_element_type=jnp.float32)   # (L, L)
        # rel-pos bias + shift mask + block-diagonal mask, combined once
        s = s + addm_ref[h]

        # explicit softmax; divide goes to the EUP via approx reciprocal
        s = s - jnp.max(s, axis=-1, keepdims=True)
        e = jnp.exp(s)
        p = e * pl.reciprocal(jnp.sum(e, axis=-1, keepdims=True), approx=True)

        attn_ref[0, h] = p.astype(attn_ref.dtype)                 # lane-dense (L, L)

        o = jnp.dot(p, v, preferred_element_type=jnp.float32)     # (L, D)
        # fold the head-concat into the output projection:
        #   concat_h(o_h) @ Wp  ==  sum_h  o_h @ Wp[h*D:(h+1)*D, :]
        acc = acc + jnp.dot(o, wproj_ref[h * head_dim:(h + 1) * head_dim, :],
                            preferred_element_type=jnp.float32)

    out_ref[0] = (acc + bproj_ref[...]).astype(out_ref.dtype)


# --------------------------- wrapper ------------------------------------------
def window_attention(x, mask, params, *, windows_per_step=None):
    """Forward of WindowAttention.

    x:    (B_, N, C) window tokens (B_ = B * num_windows, image-major).
    mask: (nW, N, N) additive 0/-100 shift mask, or None.
    Returns (out (B_, N, C), attn (B_, num_heads, N, N)) like the torch module.
    """
    B_, N, C = x.shape
    num_heads = params["num_heads"]
    head_dim = C // num_heads

    if mask is None:
        nW = 1
        mask = jnp.zeros((1, N, N), jnp.float32)
    else:
        nW = mask.shape[0]

    if windows_per_step is None:
        windows_per_step = nW                    # one image's windows per step
    assert B_ % windows_per_step == 0 and windows_per_step % nW == 0
    G = B_ // windows_per_step                   # grid steps (>=2 feeds both v7x cores)
    L = windows_per_step * N

    # relative-position bias gather (same math as the torch forward): (H, N, N)
    rel_bias = jnp.take(params["rel_pos_table"],
                        params["rel_pos_index"].reshape(-1), axis=0)
    rel_bias = rel_bias.reshape(N, N, num_heads).transpose(2, 0, 1)

    # combined additive term: bias + shift mask on the block diagonal,
    # NEG_INF elsewhere (dense block-diagonal attention).  Shared by all steps.
    blocks = rel_bias[None] + mask[:, None]                       # (nW, H, N, N)
    addm = jnp.full((num_heads, L, L), NEG_INF, jnp.float32)
    for w in range(windows_per_step):
        addm = addm.at[:, w * N:(w + 1) * N, w * N:(w + 1) * N].set(blocks[w % nW])

    x_flat = x.reshape(G, L, C)

    kernel = functools.partial(_window_attention_kernel,
                               num_heads=num_heads, head_dim=head_dim)
    out_flat, attn_dense = pl.pallas_call(
        kernel,
        out_shape=(jax.ShapeDtypeStruct((G, L, C), x.dtype),
                   jax.ShapeDtypeStruct((G, num_heads, L, L), jnp.float32)),
        grid_spec=pltpu.PrefetchScalarGridSpec(
            num_scalar_prefetch=0, grid=(G,),
            in_specs=[
                pl.BlockSpec((1, L, C), lambda g: (g, 0, 0)),          # x group
                pl.BlockSpec((C, 3 * C), lambda g: (0, 0)),            # W_qkv (scaled)
                pl.BlockSpec((1, 3 * C), lambda g: (0, 0)),            # b_qkv (scaled)
                pl.BlockSpec((C, C), lambda g: (0, 0)),                # W_proj
                pl.BlockSpec((1, C), lambda g: (0, 0)),                # b_proj
                pl.BlockSpec((num_heads, L, L), lambda g: (0, 0, 0)),  # bias+mask
            ],
            out_specs=(pl.BlockSpec((1, L, C), lambda g: (g, 0, 0)),
                       pl.BlockSpec((1, num_heads, L, L), lambda g: (g, 0, 0, 0)))),
        compiler_params=pltpu.CompilerParams(dimension_semantics=("parallel",)),
    )(x_flat, params["w_qkv_scaled"], params["b_qkv_scaled"],
      params["w_proj"], params["b_proj"], addm)

    out = out_flat.reshape(B_, N, C)

    # extract the per-window diagonal blocks -> (B_, num_heads, N, N)
    a = attn_dense.reshape(G, num_heads, windows_per_step, N, windows_per_step, N)
    idx = jnp.arange(windows_per_step)
    a = a[:, :, idx, :, idx, :]                          # (wps, G, H, N, N)
    attn = jnp.transpose(a, (1, 0, 2, 3, 4)).reshape(B_, num_heads, N, N)
    return out, attn


# --------------------------- parameters ---------------------------------------
def init_window_attention_params(key, dim, window_size, num_heads):
    wh, ww = window_size
    N = wh * ww
    head_dim = dim // num_heads
    scale = head_dim ** -0.5
    k1, k2, k3, k4, k5 = jax.random.split(key, 5)

    # demo init (JAX layout: y = x @ W + b, i.e. W = torch_weight.T)
    w_qkv = (jax.random.normal(k1, (dim, 3 * dim)) * 0.1).astype(jnp.float32)
    b_qkv = (jax.random.normal(k2, (1, 3 * dim)) * 0.05).astype(jnp.float32)
    w_proj = (jax.random.normal(k3, (dim, dim)) * 0.1).astype(jnp.float32)
    b_proj = (jax.random.normal(k4, (1, dim)) * 0.05).astype(jnp.float32)
    # TODO(synk): trunc_normal_(std=0.02) approximated by a plain normal init.
    rel_pos_table = (jax.random.normal(k5, ((2 * wh - 1) * (2 * ww - 1), num_heads))
                     * 0.02).astype(jnp.float32)

    # relative_position_index — identical construction to the torch module
    coords = np.stack(np.meshgrid(np.arange(wh), np.arange(ww), indexing="ij"))
    cf = coords.reshape(2, -1)
    rel = (cf[:, :, None] - cf[:, None, :]).transpose(1, 2, 0).astype(np.int64)
    rel[:, :, 0] += wh - 1
    rel[:, :, 1] += ww - 1
    rel[:, :, 0] *= 2 * ww - 1
    rel_pos_index = jnp.asarray(rel.sum(-1), jnp.int32)           # (N, N)

    # fold the qk scale into the q columns (one-time, host side)
    q_scale = jnp.concatenate([jnp.full((dim,), scale, jnp.float32),
                               jnp.ones((2 * dim,), jnp.float32)])
    return dict(
        num_heads=num_heads, scale=scale,
        w_qkv=w_qkv, b_qkv=b_qkv, w_proj=w_proj, b_proj=b_proj,
        rel_pos_table=rel_pos_table, rel_pos_index=rel_pos_index,
        w_qkv_scaled=w_qkv * q_scale[None, :],
        b_qkv_scaled=b_qkv * q_scale[None, :],
    )


def swin_shift_mask(H, W, window, shift):
    """Swin-style 0/-100 shifted-window attention mask, shape (nW, ws*ws, ws*ws)."""
    img = np.zeros((H, W), np.float32)
    cnt = 0
    for hs in (slice(0, -window), slice(-window, -shift), slice(-shift, None)):
        for ws in (slice(0, -window), slice(-window, -shift), slice(-shift, None)):
            img[hs, ws] = cnt
            cnt += 1
    mw = img.reshape(H // window, window, W // window, window)
    mw = mw.transpose(0, 2, 1, 3).reshape(-1, window * window)
    am = mw[:, None, :] - mw[:, :, None]
    return jnp.asarray(np.where(am != 0, -100.0, 0.0), np.float32)


# --------------------------- pure-JAX reference --------------------------------
def window_attention_ref(x, mask, params):
    B_, N, C = x.shape
    H = params["num_heads"]
    D = C // H
    hp = lax.Precision.HIGHEST
    qkv = jnp.dot(x, params["w_qkv"], precision=hp) + params["b_qkv"]
    qkv = qkv.reshape(B_, N, 3, H, D).transpose(2, 0, 3, 1, 4)
    q, k, v = qkv[0], qkv[1], qkv[2]
    q = q * params["scale"]
    attn = jnp.einsum("bhnd,bhmd->bhnm", q, k, precision=hp)
    rel_bias = jnp.take(params["rel_pos_table"],
                        params["rel_pos_index"].reshape(-1), axis=0)
    rel_bias = rel_bias.reshape(N, N, H).transpose(2, 0, 1)
    attn = attn + rel_bias[None]
    if mask is not None:
        nW = mask.shape[0]
        attn = attn.reshape(B_ // nW, nW, H, N, N) + mask[None, :, None]
        attn = attn.reshape(B_, H, N, N)
    attn = jax.nn.softmax(attn, axis=-1)
    out = jnp.einsum("bhnm,bhmd->bhnd", attn, v, precision=hp)
    out = out.transpose(0, 2, 1, 3).reshape(B_, N, C)
    out = jnp.dot(out, params["w_proj"], precision=hp) + params["b_proj"]
    return out, attn


# --------------------------- main ----------------------------------------------
if __name__ == "__main__":
    key = jax.random.PRNGKey(0)
    kx, kp = jax.random.split(key)

    DIM, NUM_HEADS, WINDOW = 32, 4, 4
    H_RES = W_RES = 8
    SHIFT = WINDOW // 2
    N = WINDOW * WINDOW                       # 16 tokens per window
    nW = (H_RES // WINDOW) * (W_RES // WINDOW)  # 4 windows per image
    B = 2
    B_ = B * nW                               # 8 windows total

    params = init_window_attention_params(kp, DIM, (WINDOW, WINDOW), NUM_HEADS)
    x = jax.random.normal(kx, (B_, N, DIM), jnp.float32)      # (8, 16, 32)
    mask = swin_shift_mask(H_RES, W_RES, WINDOW, SHIFT)       # (4, 16, 16)

    fwd = jax.jit(functools.partial(window_attention, params=params))
    out, attn = fwd(x, mask)
    jax.block_until_ready((out, attn))

    assert out.shape == (B_, N, DIM)
    assert attn.shape == (B_, NUM_HEADS, N, N)

    # correctness vs a pure-JAX reference of the torch forward
    ref_out, ref_attn = window_attention_ref(x, mask, params)
    np.testing.assert_allclose(np.asarray(attn), np.asarray(ref_attn),
                               atol=2e-3, rtol=1e-2)
    np.testing.assert_allclose(np.asarray(out), np.asarray(ref_out),
                               atol=2e-3, rtol=1e-2)

    print("KERNEL_OK")
</pallas_src>

<mosaic_0001>
module attributes {stable_mosaic.version = 11 : i64} {
  func.func @_window_attention_kernel(%arg0: i32, %arg1: memref<1x64x32xf32, #tpu.memory_space<vmem>>, %arg2: memref<32x96xf32, #tpu.memory_space<vmem>>, %arg3: memref<1x96xf32, #tpu.memory_space<vmem>>, %arg4: memref<32x32xf32, #tpu.memory_space<vmem>>, %arg5: memref<1x32xf32, #tpu.memory_space<vmem>>, %arg6: memref<4x64x64xf32, #tpu.memory_space<vmem>>, %arg7: memref<1x64x32xf32, #tpu.memory_space<vmem>>, %arg8: memref<1x4x64x64xf32, #tpu.memory_space<vmem>>) attributes {dimension_semantics = [#tpu.dimension_semantics<parallel>], iteration_bounds = array<i64: 2>, scalar_prefetch = 0 : i64, scratch_operands = 0 : i64, tpu.core_type = #tpu.core_type<tc>, window_params = [{transform_indices = @transform_0, window_bounds = array<i64: 1, 64, 32>}, {pipeline_mode = #tpu.pipeline_mode<synchronous>, transform_indices = @transform_1, window_bounds = array<i64: 32, 96>}, {pipeline_mode = #tpu.pipeline_mode<synchronous>, transform_indices = @transform_2, window_bounds = array<i64: 1, 96>}, {pipeline_mode = #tpu.pipeline_mode<synchronous>, transform_indices = @transform_3, window_bounds = array<i64: 32, 32>}, {pipeline_mode = #tpu.pipeline_mode<synchronous>, transform_indices = @transform_4, window_bounds = array<i64: 1, 32>}, {pipeline_mode = #tpu.pipeline_mode<synchronous>, transform_indices = @transform_5, window_bounds = array<i64: 4, 64, 64>}, {transform_indices = @transform_6, window_bounds = array<i64: 1, 64, 32>}, {transform_indices = @transform_7, window_bounds = array<i64: 1, 4, 64, 64>}]} {
    %c0 = arith.constant 0 : index
    %c0_0 = arith.constant 0 : index
    %c0_1 = arith.constant 0 : index
    %0 = vector.load %arg1[%c0, %c0_0, %c0_1] : memref<1x64x32xf32, #tpu.memory_space<vmem>>, vector<1x64x32xf32>
    %1 = vector.shape_cast %0 : vector<1x64x32xf32> to vector<64x32xf32>
    %c0_2 = arith.constant 0 : index
    %c0_3 = arith.constant 0 : index
    %2 = vector.load %arg2[%c0_2, %c0_3] : memref<32x96xf32, #tpu.memory_space<vmem>>, vector<32x96xf32>
    %cst = arith.constant dense<0.000000e+00> : vector<64x96xf32>
    %3 = tpu.matmul %1, %2, %cst {dimension_numbers = #tpu.dot_dimension_numbers<[1], [0], [0], [1], [0, 0, 1, 1], [], []>} : vector<64x32xf32>, vector<32x96xf32>, vector<64x96xf32> -> vector<64x96xf32>
    %c0_4 = arith.constant 0 : index
    %c0_5 = arith.constant 0 : index
    %4 = vector.load %arg3[%c0_4, %c0_5] : memref<1x96xf32, #tpu.memory_space<vmem>>, vector<1x96xf32>
    %5 = vector.broadcast %4 : vector<1x96xf32> to vector<64x96xf32>
    %6 = arith.addf %3, %5 : vector<64x96xf32>
    %cst_6 = arith.constant 0.000000e+00 : f32
    %7 = vector.broadcast %cst_6 : f32 to vector<64x32xf32>
    %8 = vector.extract_strided_slice %6 {offsets = [0, 0], sizes = [64, 8], strides = [1, 1]} : vector<64x96xf32> to vector<64x8xf32>
    %9 = vector.extract_strided_slice %6 {offsets = [0, 32], sizes = [64, 8], strides = [1, 1]} : vector<64x96xf32> to vector<64x8xf32>
    %10 = vector.extract_strided_slice %6 {offsets = [0, 64], sizes = [64, 8], strides = [1, 1]} : vector<64x96xf32> to vector<64x8xf32>
    %cst_7 = arith.constant dense<0.000000e+00> : vector<64x64xf32>
    %11 = tpu.matmul %8, %9, %cst_7 {dimension_numbers = #tpu.dot_dimension_numbers<[1], [1], [0], [0], [0, 0, 1, 0], [], []>} : vector<64x8xf32>, vector<64x8xf32>, vector<64x64xf32> -> vector<64x64xf32>
    %c0_8 = arith.constant 0 : index
    %c0_9 = arith.constant 0 : index
    %c0_10 = arith.constant 0 : index
    %12 = vector.load %arg6[%c0_8, %c0_9, %c0_10] : memref<4x64x64xf32, #tpu.memory_space<vmem>>, vector<1x64x64xf32>
    %13 = vector.shape_cast %12 : vector<1x64x64xf32> to vector<64x64xf32>
    %14 = arith.addf %11, %13 : vector<64x64xf32>
    %cst_11 = arith.constant dense<0xFF800000> : vector<64xf32>
    %15 = vector.multi_reduction <maximumf>, %14, %cst_11 [1] : vector<64x64xf32> to vector<64xf32>
    %16 = vector.shape_cast %15 : vector<64xf32> to vector<64x1xf32>
    %17 = vector.broadcast %16 : vector<64x1xf32> to vector<64x64xf32>
    %18 = arith.subf %14, %17 : vector<64x64xf32>
    %19 = math.exp %18 : vector<64x64xf32>
    %cst_12 = arith.constant dense<0.000000e+00> : vector<64xf32>
    %20 = vector.multi_reduction <add>, %19, %cst_12 [1] : vector<64x64xf32> to vector<64xf32>
    %21 = vector.shape_cast %20 : vector<64xf32> to vector<64x1xf32>
    %22 = tpu.reciprocal %21 {approx = true} : vector<64x1xf32> -> vector<64x1xf32>
    %23 = vector.broadcast %22 : vector<64x1xf32> to vector<64x64xf32>
    %24 = arith.mulf %19, %23 : vector<64x64xf32>
    %c0_13 = arith.constant 0 : index
    %c0_14 = arith.constant 0 : index
    %c0_15 = arith.constant 0 : index
    %c0_16 = arith.constant 0 : index
    %25 = vector.load %arg8[%c0_13, %c0_14, %c0_15, %c0_16] : memref<1x4x64x64xf32, #tpu.memory_space<vmem>>, vector<1x1x64x64xf32>
    %26 = vector.shape_cast %25 : vector<1x1x64x64xf32> to vector<64x64xf32>
    %27 = vector.shape_cast %24 : vector<64x64xf32> to vector<1x1x64x64xf32>
    tpu.vector_store %arg8[%c0_13, %c0_14, %c0_15, %c0_16], %27 {strides = array<i32>} : memref<1x4x64x64xf32, #tpu.memory_space<vmem>>, vector<1x1x64x64xf32>,
    %cst_17 = arith.constant dense<0.000000e+00> : vector<64x8xf32>
    %28 = tpu.matmul %24, %10, %cst_17 {dimension_numbers = #tpu.dot_dimension_numbers<[1], [0], [0], [1], [0, 0, 1, 1], [], []>} : vector<64x64xf32>, vector<64x8xf32>, vector<64x8xf32> -> vector<64x8xf32>
    %c0_18 = arith.constant 0 : index
    %c0_19 = arith.constant 0 : index
    %29 = vector.load %arg4[%c0_18, %c0_19] : memref<32x32xf32, #tpu.memory_space<vmem>>, vector<8x32xf32>
    %cst_20 = arith.constant dense<0.000000e+00> : vector<64x32xf32>
    %30 = tpu.matmul %28, %29, %cst_20 {dimension_numbers = #tpu.dot_dimension_numbers<[1], [0], [0], [1], [0, 0, 1, 1], [], []>} : vector<64x8xf32>, vector<8x32xf32>, vector<64x32xf32> -> vector<64x32xf32>
    %31 = arith.addf %7, %30 : vector<64x32xf32>
    %32 = vector.extract_strided_slice %6 {offsets = [0, 8], sizes = [64, 8], strides = [1, 1]} : vector<64x96xf32> to vector<64x8xf32>
    %33 = vector.extract_strided_slice %6 {offsets = [0, 40], sizes = [64, 8], strides = [1, 1]} : vector<64x96xf32> to vector<64x8xf32>
    %34 = vector.extract_strided_slice %6 {offsets = [0, 72], sizes = [64, 8], strides = [1, 1]} : vector<64x96xf32> to vector<64x8xf32>
    %cst_21 = arith.constant dense<0.000000e+00> : vector<64x64xf32>
    %35 = tpu.matmul %32, %33, %cst_21 {dimension_numbers = #tpu.dot_dimension_numbers<[1], [1], [0], [0], [0, 0, 1, 0], [], []>} : vector<64x8xf32>, vector<64x8xf32>, vector<64x64xf32> -> vector<64x64xf32>
    %c1 = arith.constant 1 : index
    %c0_22 = arith.constant 0 : index
    %c0_23 = arith.constant 0 : index
    %36 = vector.load %arg6[%c1, %c0_22, %c0_23] : memref<4x64x64xf32, #tpu.memory_space<vmem>>, vector<1x64x64xf32>
    %37 = vector.shape_cast %36 : vector<1x64x64xf32> to vector<64x64xf32>
    %38 = arith.addf %35, %37 : vector<64x64xf32>
    %cst_24 = arith.constant dense<0xFF800000> : vector<64xf32>
    %39 = vector.multi_reduction <maximumf>, %38, %cst_24 [1] : vector<64x64xf32> to vector<64xf32>
    %40 = vector.shape_cast %39 : vector<64xf32> to vector<64x1xf32>
    %41 = vector.broadcast %40 : vector<64x1xf32> to vector<64x64xf32>
    %42 = arith.subf %38, %41 : vector<64x64xf32>
    %43 = math.exp %42 : vector<64x64xf32>
    %cst_25 = arith.constant dense<0.000000e+00> : vector<64xf32>
    %44 = vector.multi_reduction <add>, %43, %cst_25 [1] : vector<64x64xf32> to vector<64xf32>
    %45 = vector.shape_cast %44 : vector<64xf32> to vector<64x1xf32>
    %46 = tpu.reciprocal %45 {approx = true} : vector<64x1xf32> -> vector<64x1xf32>
    %47 = vector.broadcast %46 : vector<64x1xf32> to vector<64x64xf32>
    %48 = arith.mulf %43, %47 : vector<64x64xf32>
    %c0_26 = arith.constant 0 : index
    %c1_27 = arith.constant 1 : index
    %c0_28 = arith.constant 0 : index
    %c0_29 = arith.constant 0 : index
    %49 = vector.load %arg8[%c0_26, %c1_27, %c0_28, %c0_29] : memref<1x4x64x64xf32, #tpu.memory_space<vmem>>, vector<1x1x64x64xf32>
    %50 = vector.shape_cast %49 : vector<1x1x64x64xf32> to vector<64x64xf32>
    %51 = vector.shape_cast %48 : vector<64x64xf32> to vector<1x1x64x64xf32>
    tpu.vector_store %arg8[%c0_26, %c1_27, %c0_28, %c0_29], %51 {strides = array<i32>} : memref<1x4x64x64xf32, #tpu.memory_space<vmem>>, vector<1x1x64x64xf32>,
    %cst_30 = arith.constant dense<0.000000e+00> : vector<64x8xf32>
    %52 = tpu.matmul %48, %34, %cst_30 {dimension_numbers = #tpu.dot_dimension_numbers<[1], [0], [0], [1], [0, 0, 1, 1], [], []>} : vector<64x64xf32>, vector<64x8xf32>, vector<64x8xf32> -> vector<64x8xf32>
    %c8 = arith.constant 8 : index
    %c0_31 = arith.constant 0 : index
    %53 = vector.load %arg4[%c8, %c0_31] : memref<32x32xf32, #tpu.memory_space<vmem>>, vector<8x32xf32>
    %cst_32 = arith.constant dense<0.000000e+00> : vector<64x32xf32>
    %54 = tpu.matmul %52, %53, %cst_32 {dimension_numbers = #tpu.dot_dimension_numbers<[1], [0], [0], [1], [0, 0, 1, 1], [], []>} : vector<64x8xf32>, vector<8x32xf32>, vector<64x32xf32> -> vector<64x32xf32>
    %55 = arith.addf %31, %54 : vector<64x32xf32>
    %56 = vector.extract_strided_slice %6 {offsets = [0, 16], sizes = [64, 8], strides = [1, 1]} : vector<64x96xf32> to vector<64x8xf32>
    %57 = vector.extract_strided_slice %6 {offsets = [0, 48], sizes = [64, 8], strides = [1, 1]} : vector<64x96xf32> to vector<64x8xf32>
    %58 = vector.extract_strided_slice %6 {offsets = [0, 80], sizes = [64, 8], strides = [1, 1]} : vector<64x96xf32> to vector<64x8xf32>
    %cst_33 = arith.constant dense<0.000000e+00> : vector<64x64xf32>
    %59 = tpu.matmul %56, %57, %cst_33 {dimension_numbers = #tpu.dot_dimension_numbers<[1], [1], [0], [0], [0, 0, 1, 0], [], []>} : vector<64x8xf32>, vector<64x8xf32>, vector<64x64xf32> -> vector<64x64xf32>
    %c2 = arith.constant 2 : index
    %c0_34 = arith.constant 0 : index
    %c0_35 = arith.constant 0 : index
    %60 = vector.load %arg6[%c2, %c0_34, %c0_35] : memref<4x64x64xf32, #tpu.memory_space<vmem>>, vector<1x64x64xf32>
    %61 = vector.shape_cast %60 : vector<1x64x64xf32> to vector<64x64xf32>
    %62 = arith.addf %59, %61 : vector<64x64xf32>
    %cst_36 = arith.constant dense<0xFF800000> : vector<64xf32>
    %63 = vector.multi_reduction <maximumf>, %62, %cst_36 [1] : vector<64x64xf32> to vector<64xf32>
    %64 = vector.shape_cast %63 : vector<64xf32> to vector<64x1xf32>
    %65 = vector.broadcast %64 : vector<64x1xf32> to vector<64x64xf32>
    %66 = arith.subf %62, %65 : vector<64x64xf32>
    %67 = math.exp %66 : vector<64x64xf32>
    %cst_37 = arith.constant dense<0.000000e+00> : vector<64xf32>
    %68 = vector.multi_reduction <add>, %67, %cst_37 [1] : vector<64x64xf32> to vector<64xf32>
    %69 = vector.shape_cast %68 : vector<64xf32> to vector<64x1xf32>
    %70 = tpu.reciprocal %69 {approx = true} : vector<64x1xf32> -> vector<64x1xf32>
    %71 = vector.broadcast %70 : vector<64x1xf32> to vector<64x64xf32>
    %72 = arith.mulf %67, %71 : vector<64x64xf32>
    %c0_38 = arith.constant 0 : index
    %c2_39 = arith.constant 2 : index
    %c0_40 = arith.constant 0 : index
    %c0_41 = arith.constant 0 : index
    %73 = vector.load %arg8[%c0_38, %c2_39, %c0_40, %c0_41] : memref<1x4x64x64xf32, #tpu.memory_space<vmem>>, vector<1x1x64x64xf32>
    %74 = vector.shape_cast %73 : vector<1x1x64x64xf32> to vector<64x64xf32>
    %75 = vector.shape_cast %72 : vector<64x64xf32> to vector<1x1x64x64xf32>
    tpu.vector_store %arg8[%c0_38, %c2_39, %c0_40, %c0_41], %75 {strides = array<i32>} : memref<1x4x64x64xf32, #tpu.memory_space<vmem>>, vector<1x1x64x64xf32>,
    %cst_42 = arith.constant dense<0.000000e+00> : vector<64x8xf32>
    %76 = tpu.matmul %72, %58, %cst_42 {dimension_numbers = #tpu.dot_dimension_numbers<[1], [0], [0], [1], [0, 0, 1, 1], [], []>} : vector<64x64xf32>, vector<64x8xf32>, vector<64x8xf32> -> vector<64x8xf32>
    %c16 = arith.constant 16 : index
    %c0_43 = arith.constant 0 : index
    %77 = vector.load %arg4[%c16, %c0_43] : memref<32x32xf32, #tpu.memory_space<vmem>>, vector<8x32xf32>
    %cst_44 = arith.constant dense<0.000000e+00> : vector<64x32xf32>
    %78 = tpu.matmul %76, %77, %cst_44 {dimension_numbers = #tpu.dot_dimension_numbers<[1], [0], [0], [1], [0, 0, 1, 1], [], []>} : vector<64x8xf32>, vector<8x32xf32>, vector<64x32xf32> -> vector<64x32xf32>
    %79 = arith.addf %55, %78 : vector<64x32xf32>
    %80 = vector.extract_strided_slice %6 {offsets = [0, 24], sizes = [64, 8], strides = [1, 1]} : vector<64x96xf32> to vector<64x8xf32>
    %81 = vector.extract_strided_slice %6 {offsets = [0, 56], sizes = [64, 8], strides = [1, 1]} : vector<64x96xf32> to vector<64x8xf32>
    %82 = vector.extract_strided_slice %6 {offsets = [0, 88], sizes = [64, 8], strides = [1, 1]} : vector<64x96xf32> to vector<64x8xf32>
    %cst_45 = arith.constant dense<0.000000e+00> : vector<64x64xf32>
    %83 = tpu.matmul %80, %81, %cst_45 {dimension_numbers = #tpu.dot_dimension_numbers<[1], [1], [0], [0], [0, 0, 1, 0], [], []>} : vector<64x8xf32>, vector<64x8xf32>, vector<64x64xf32> -> vector<64x64xf32>
    %c3 = arith.constant 3 : index
    %c0_46 = arith.constant 0 : index
    %c0_47 = arith.constant 0 : index
    %84 = vector.load %arg6[%c3, %c0_46, %c0_47] : memref<4x64x64xf32, #tpu.memory_space<vmem>>, vector<1x64x64xf32>
    %85 = vector.shape_cast %84 : vector<1x64x64xf32> to vector<64x64xf32>
    %86 = arith.addf %83, %85 : vector<64x64xf32>
    %cst_48 = arith.constant dense<0xFF800000> : vector<64xf32>
    %87 = vector.multi_reduction <maximumf>, %86, %cst_48 [1] : vector<64x64xf32> to vector<64xf32>
    %88 = vector.shape_cast %87 : vector<64xf32> to vector<64x1xf32>
    %89 = vector.broadcast %88 : vector<64x1xf32> to vector<64x64xf32>
    %90 = arith.subf %86, %89 : vector<64x64xf32>
    %91 = math.exp %90 : vector<64x64xf32>
    %cst_49 = arith.constant dense<0.000000e+00> : vector<64xf32>
    %92 = vector.multi_reduction <add>, %91, %cst_49 [1] : vector<64x64xf32> to vector<64xf32>
    %93 = vector.shape_cast %92 : vector<64xf32> to vector<64x1xf32>
    %94 = tpu.reciprocal %93 {approx = true} : vector<64x1xf32> -> vector<64x1xf32>
    %95 = vector.broadcast %94 : vector<64x1xf32> to vector<64x64xf32>
    %96 = arith.mulf %91, %95 : vector<64x64xf32>
    %c0_50 = arith.constant 0 : index
    %c3_51 = arith.constant 3 : index
    %c0_52 = arith.constant 0 : index
    %c0_53 = arith.constant 0 : index
    %97 = vector.load %arg8[%c0_50, %c3_51, %c0_52, %c0_53] : memref<1x4x64x64xf32, #tpu.memory_space<vmem>>, vector<1x1x64x64xf32>
    %98 = vector.shape_cast %97 : vector<1x1x64x64xf32> to vector<64x64xf32>
    %99 = vector.shape_cast %96 : vector<64x64xf32> to vector<1x1x64x64xf32>
    tpu.vector_store %arg8[%c0_50, %c3_51, %c0_52, %c0_53], %99 {strides = array<i32>} : memref<1x4x64x64xf32, #tpu.memory_space<vmem>>, vector<1x1x64x64xf32>,
    %cst_54 = arith.constant dense<0.000000e+00> : vector<64x8xf32>
    %100 = tpu.matmul %96, %82, %cst_54 {dimension_numbers = #tpu.dot_dimension_numbers<[1], [0], [0], [1], [0, 0, 1, 1], [], []>} : vector<64x64xf32>, vector<64x8xf32>, vector<64x8xf32> -> vector<64x8xf32>
    %c24 = arith.constant 24 : index
    %c0_55 = arith.constant 0 : index
    %101 = vector.load %arg4[%c24, %c0_55] : memref<32x32xf32, #tpu.memory_space<vmem>>, vector<8x32xf32>
    %cst_56 = arith.constant dense<0.000000e+00> : vector<64x32xf32>
    %102 = tpu.matmul %100, %101, %cst_56 {dimension_numbers = #tpu.dot_dimension_numbers<[1], [0], [0], [1], [0, 0, 1, 1], [], []>} : vector<64x8xf32>, vector<8x32xf32>, vector<64x32xf32> -> vector<64x32xf32>
    %103 = arith.addf %79, %102 : vector<64x32xf32>
    %c0_57 = arith.constant 0 : index
    %c0_58 = arith.constant 0 : index
    %104 = vector.load %arg5[%c0_57, %c0_58] : memref<1x32xf32, #tpu.memory_space<vmem>>, vector<1x32xf32>
    %105 = vector.broadcast %104 : vector<1x32xf32> to vector<64x32xf32>
    %106 = arith.addf %103, %105 : vector<64x32xf32>
    %c0_59 = arith.constant 0 : index
    %c0_60 = arith.constant 0 : index
    %c0_61 = arith.constant 0 : index
    %107 = vector.load %arg7[%c0_59, %c0_60, %c0_61] : memref<1x64x32xf32, #tpu.memory_space<vmem>>, vector<1x64x32xf32>
    %108 = vector.shape_cast %107 : vector<1x64x32xf32> to vector<64x32xf32>
    %109 = vector.shape_cast %106 : vector<64x32xf32> to vector<1x64x32xf32>
    tpu.vector_store %arg7[%c0_59, %c0_60, %c0_61], %109 {strides = array<i32>} : memref<1x64x32xf32, #tpu.memory_space<vmem>>, vector<1x64x32xf32>,
    return
  }
  func.func @transform_0(%arg0: i32) -> (i32, i32, i32) {
    %c0_i32 = arith.constant 0 : i32
    %c0_i32_0 = arith.constant 0 : i32
    %c0_i32_1 = arith.constant 0 : i32
    return %arg0, %c0_i32, %c0_i32_0 : i32, i32, i32
  }
  func.func @transform_1(%arg0: i32) -> (i32, i32) {
    %c0_i32 = arith.constant 0 : i32
    %c0_i32_0 = arith.constant 0 : i32
    %c0_i32_1 = arith.constant 0 : i32
    return %c0_i32, %c0_i32_0 : i32, i32
  }
  func.func @transform_2(%arg0: i32) -> (i32, i32) {
    %c0_i32 = arith.constant 0 : i32
    %c0_i32_0 = arith.constant 0 : i32
    %c0_i32_1 = arith.constant 0 : i32
    return %c0_i32, %c0_i32_0 : i32, i32
  }
  func.func @transform_3(%arg0: i32) -> (i32, i32) {
    %c0_i32 = arith.constant 0 : i32
    %c0_i32_0 = arith.constant 0 : i32
    %c0_i32_1 = arith.constant 0 : i32
    return %c0_i32, %c0_i32_0 : i32, i32
  }
  func.func @transform_4(%arg0: i32) -> (i32, i32) {
    %c0_i32 = arith.constant 0 : i32
    %c0_i32_0 = arith.constant 0 : i32
    %c0_i32_1 = arith.constant 0 : i32
    return %c0_i32, %c0_i32_0 : i32, i32
  }
  func.func @transform_5(%arg0: i32) -> (i32, i32, i32) {
    %c0_i32 = arith.constant 0 : i32
    %c0_i32_0 = arith.constant 0 : i32
    %c0_i32_1 = arith.constant 0 : i32
    %c0_i32_2 = arith.constant 0 : i32
    return %c0_i32, %c0_i32_0, %c0_i32_1 : i32, i32, i32
  }
  func.func @transform_6(%arg0: i32) -> (i32, i32, i32) {
    %c0_i32 = arith.constant 0 : i32
    %c0_i32_0 = arith.constant 0 : i32
    %c0_i32_1 = arith.constant 0 : i32
    return %arg0, %c0_i32, %c0_i32_0 : i32, i32, i32
  }
  func.func @transform_7(%arg0: i32) -> (i32, i32, i32, i32) {
    %c0_i32 = arith.constant 0 : i32
    %c0_i32_0 = arith.constant 0 : i32
    %c0_i32_1 = arith.constant 0 : i32
    %c0_i32_2 = arith.constant 0 : i32
    return %arg0, %c0_i32, %c0_i32_0, %c0_i32_1 : i32, i32, i32, i32
  }
}

</mosaic_0001>

<bundles_post_ra>
// kernel: window_attention.1
= control target key start
LH: loop header
LB: loop body
LE: loop exit
PB: predicated region body
PF: predicated region fallthrough
CT: control target
= control target key end

     0   :  { %13 = vsyncpa [#allocation3], 0  ;;  %s4749_s0 = inlined_call_operand.vmem [shape: f32[2,64,32], index: 0, kind: input, shape index: {}]   ;;  %s4750_s1 = inlined_call_operand.vmem [shape: f32[32,96], index: 1, kind: input, shape index: {}]   ;;  %s4751_s2 = inlined_call_operand.vmem [shape: f32[1,96], index: 2, kind: input, shape index: {}]   ;;  %s4752_s3 = inlined_call_operand.vmem [shape: f32[32,32], index: 3, kind: input, shape index: {}]   ;;  %s4753_s4 = inlined_call_operand.vmem [shape: f32[1,32], index: 4, kind: input, shape index: {}]   ;;  %s4754_s5 = inlined_call_operand.vmem [shape: f32[4,64,64], index: 5, kind: input, shape index: {}]   ;;  %s4755_s6 = inlined_call_operand.hbm [shape: f32[2,64,32], index: 6, kind: output, shape index: {0}]   ;;  %s4756_s7 = inlined_call_operand.vmem [shape: f32[2,4,64,64], index: 7, kind: output, shape index: {1}]  }
   0x1   :  { %15 = vsyncpa [#allocation3 + $0x1], 0  ;;  %s3802_s24 = smov 0   ;;  %s3804_s25 = smov 0  }
   0x2   :  { %s3806_s26 = smov 0   ;;  %s3808_s27 = smov 0  }
   0x3 LB: > { %s3823_s28 = sadd.s32 4294967295, %s3746_s27   ;;  %s2811_s29 = sadd.s32 4294967294, %s3746_s27   ;;  %s3746_s27 = sphi %s3808_s27, %s4762_s27   ;;  %s3742_s26 = sphi %s3806_s26, %s4761_s26   ;;  %s3738_s25 = sphi %s3804_s25, %s4760_s25   ;;  %s3734_s24 = sphi %s3802_s24, %s4759_s24  }
   0x4   : > { %s3827_s30 = sadd.s32 1, %s3746_s27   ;;  %s159_s8 = sadd.s32 1, %s3742_s26 }
   0x5   : > { %s156_s9 = ssub.s32 %s3746_s27, %s3827_s30  ;;  %p169_p0 = scmp.ne.s32.totalorder %s3742_s26, %s3738_s25 }
   0x6   : > { %p157_p1 = scmp.eq.s32.totalorder %s156_s9, 0  ;;  %p170_p2 = scmp.eq.s32.totalorder %s3823_s28, 1 }
   0x7   : > { %p175_p3 = scmp.ne.s32.totalorder %s3738_s25, %s3734_s24  ;;  %p176_p4 = scmp.eq.s32.totalorder %s2811_s29, 1 }
   0x8   : > { %s3838_s10 = scalar_select %p157_p1, %s3742_s26, %s159_s8  }
   0x9   : > { %p3840_p5 = por %p170_p2, %p169_p0  ;;  %p3844_p6 = por %p176_p4, %p175_p3 }
   0xa   : > { %p2814_p7 = scmp.ge.s32.totalorder %s3746_s27, 1  ;;  %p243_p8 = scmp.lt.s32.totalorder %s3746_s27, 3 }
   0xc   : > { %p244_p9 = pnand %p2814_p7, %p243_p8 }
   0xd   : > { %p280_p10 = scmp.lt.s32.totalorder (!%p244_p9), %s3823_s28, 1  ;;  %s3748_s14 = smov (!%p244_p9), 96  }
   0xe   : > { %247 = sbr.rel (%p244_p9) target bundleno = 2937 (0xb79), region = 44  ;;  %s3749_s15 = smov (!%p244_p9), 64  }
   0xf   : > { %s3750_s16 = smov (!%p244_p9), 88   ;;  %s3752_s23 = smov (!%p244_p9), 56  }
  0x10   : > { %s3753_s20 = smov (!%p244_p9), 80   ;;  %s3755_s21 = smov (!%p244_p9), 72  }
  0x11   : > { %s3758_s13 = smov (!%p244_p9), 40  }
  0x13   : > { %v301_v0 = vld [vmem:[%s4750_s1 + $0x18] sm:$0xff]  ;;  %v300_v1 = vld [vmem:[%s4750_s1 + $0x10] sm:$0xff]  ;;  %v299_v2 = vld [vmem:[%s4750_s1 + $0x8] sm:$0xff]  ;;  %s3861_s19 = scalar_select %p280_p10, %s3823_s28, 1  ;;  %vm309_vm0 = vcmask 261120   ;;  %vm471_vm1 = vcmask 64512  }
  0x14   : > { %3190 = vmatprep.subr.mxu0 %v301_v0  ;;  %v298_v3 = vld [vmem:[%s4750_s1] sm:$0xff]  ;;  %v440_v46 = vld [vmem:[%s4754_s5 + $0x8] sm:$0xff]  ;;  %vm609_vm2 = vcmask 523264   ;;  %v442_v51 = vld [vmem:[%s4754_s5 + $0x18] sm:$0xff] }
  0x15   : > { %3191 = vmatpush3.msra.mxu0 %v301_v0  ;;  %s3011_s22 = sshll.u32 %s3861_s19, 6  ;;  %v2820_v13 = vld [vmem:[%s4751_s2] ss:$0 sm:$0xff]  ;;  %v441_v58 = vld [vmem:[%s4754_s5 + $0x10] sm:$0xff]  ;;  %v444_v63 = vld [vmem:[%s4754_s5 + $0x28] sm:$0xff] }
  0x16   : > { %3192 = vmatprep.subr.mxu0 %v300_v1  ;;  %s284_s8 = scalar_lea.vmem %s4749_s0, %s3011_s22  ;;  %v439_v48 = vld [vmem:[%s4754_s5] sm:$0xff]  ;;  %s3751_s22 = smov 120  }
  0x17   : > { %3193 = vmatpush3.msra.mxu0 %v300_v1  ;;  %v290_v4 = vld [vmem:[%s284_s8] sm:$0xff]  ;;  %v291_v5 = vld [vmem:[%s284_s8 + $0x8] sm:$0xff]  ;;  %v292_v6 = vld [vmem:[%s284_s8 + $0x10] sm:$0xff] }
  0x18   : > { %3194 = vmatprep.subr.mxu0 %v299_v2  ;;  %3198 = vmatprep.mubr.msk.f32.mxu0 %vm309_vm0, %v290_v4  ;;  %v293_v7 = vld [vmem:[%s284_s8 + $0x18] sm:$0xff]  ;;  %v294_v8 = vld [vmem:[%s284_s8 + $0x20] sm:$0xff]  ;;  %v295_v9 = vld [vmem:[%s284_s8 + $0x28] sm:$0xff] }
  0x19   : > { %3195 = vmatpush3.msra.mxu0 %v299_v2  ;;  %v296_v10 = vld [vmem:[%s284_s8 + $0x30] sm:$0xff]  ;;  %v297_v11 = vld [vmem:[%s284_s8 + $0x38] sm:$0xff]  ;;  %v443_v60 = vld [vmem:[%s4754_s5 + $0x20] sm:$0xff] }
  0x1a   : > { %3196 = vmatprep.subr.mxu0 %v298_v3 }
  0x1b   : > { %3197 = vmatpush3.msra.mxu0 %v298_v3  ;;  %v445_v3 = vld [vmem:[%s4754_s5 + $0x30] sm:$0xff] }
  0x1c   : > { %3199 = vmatmul.mubr.msk.f32.vlgmr.msra.gmra.mxu0 %vm309_vm0, %v291_v5 }
  0x1d   : > { %3201 = vmatprep.mubr.msk.f32.mxu0 %vm309_vm0, %v292_v6 }
  0x20   : > { %3202 = vmatmul.mubr.msk.f32.gmra.mxu0 %vm309_vm0, %v293_v7  ;;  %v446_v7 = vld [vmem:[%s4754_s5 + $0x38] sm:$0xff] }
  0x21   : > { %3204 = vmatprep.mubr.msk.f32.mxu0 %vm309_vm0, %v294_v8 }
  0x24   : > { %3205 = vmatmul.mubr.msk.f32.gmra.mxu0 %vm309_vm0, %v295_v9 }
  0x25   : > { %3207 = vmatprep.mubr.msk.f32.mxu0 %vm309_vm0, %v296_v10 }
  0x28   : > { %3208 = vmatmul.mubr.msk.f32.gmra.mxu0 %vm309_vm0, %v297_v11 }
  0xdc   : > { %v3200_v12 = vpop.f32.mrf.mxu0 }
  0xdd   : > { %v3904_v28 = vadd.f32 %v3200_v12, %v2820_v13 }
  0xde   : > { %v400_v14 = vpop.f32.mrf.mxu0 }
  0xdf   : > { %v3881_v15 = vadd.f32 %v2820_v13, %v400_v14 }
  0xe0   : > { %v3203_v16 = vpop.f32.mrf.mxu0 }
  0xe1   : > { %3226 = vmatprep.mubr.msk.f32.mxu1 %vm471_vm1, %v3881_v15  ;;  %v3900_v27 = vadd.f32 %v3203_v16, %v2820_v13 }
  0xe2   : > { %v410_v17 = vpop.f32.mrf.mxu0 }
  0xe3   : > { %v3894_v25 = vadd.f32 %v2820_v13, %v410_v17 }
  0xe4   : > { %v3206_v18 = vpop.f32.mrf.mxu0 }
  0xe5   : > { %v3885_v19 = vadd.f32 %v3206_v18, %v2820_v13 }
  0xe6   : > { %v420_v20 = vpop.f32.mrf.mxu0 }
  0xe7   : > { %465 = vrot.lane.b32.xlu1 %v3885_v19, %s3748_s14  ;;  %v3888_v22 = vadd.f32 %v2820_v13, %v420_v20 }
  0xe8   : > { %v3209_v21 = vpop.f32.mrf.mxu0 }
  0xe9   : > { %v3890_v23 = vadd.f32 %v3209_v21, %v2820_v13 }
  0xea   : > { %v430_v24 = vpop.f32.mrf.mxu0 }
  0xeb   : > { %469 = vrot.lane.b32.xlu0 %v3890_v23, %s3748_s14  ;;  %463 = vrot.lane.b32.xlu1 %v3888_v22, %s3748_s14  ;;  %v3896_v26 = vadd.f32 %v2820_v13, %v430_v24 }
  0xef   : > { %467 = vrot.lane.b32.xlu0 %v3896_v26, %s3748_s14  ;;  %459 = vrot.lane.b32.xlu1 %v3894_v25, %s3748_s14 }
  0xf3   : > { %461 = vrot.lane.b32.xlu0 %v3900_v27, %s3748_s14  ;;  %455 = vrot.lane.b32.xlu1 %v3881_v15, %s3748_s14 }
  0xf7   : > { %457 = vrot.lane.b32.xlu0 %v3904_v28, %s3748_s14  ;;  %720 = vrot.lane.b32.xlu1 %v3890_v23, %s3749_s15 }
  0xfb   : > { %712 = vrot.lane.b32.xlu0 %v3900_v27, %s3749_s15  ;;  %716 = vrot.lane.b32.xlu1 %v3885_v19, %s3749_s15 }
  0xff   : > { %708 = vrot.lane.b32.xlu0 %v3904_v28, %s3749_s15  ;;  %714 = vrot.lane.b32.xlu1 %v3888_v22, %s3749_s15 }
 0x103   : > { %899 = vrot.lane.b32.xlu0 %v3890_v23, %s3750_s16  ;;  %710 = vrot.lane.b32.xlu1 %v3894_v25, %s3749_s15 }
 0x107   : > { %718 = vrot.lane.b32.xlu0 %v3896_v26, %s3749_s15  ;;  %706 = vrot.lane.b32.xlu1 %v3881_v15, %s3749_s15  ;;  %s3013_s15 = sshll.u32 %s3823_s28, 10 }
 0x10b   : > { %897 = vrot.lane.b32.xlu1 %v3896_v26, %s3750_s16 }
 0x159   : > { %v466_v29 = vpop.permute.xlu1 %465 }
 0x15d   : > { %v470_v30 = vpop.permute.xlu0 %469  ;;  %v464_v31 = vpop.permute.xlu1 %463 }
 0x15e   : > { %3210 = vmatprep.subr.msk.mxu1 %vm471_vm1, %v470_v30 }
 0x15f   : > { %3211 = vmatpush3.xpose.msk.msra.mxu1 %vm471_vm1, %v470_v30 }
 0x161   : > { %v468_v32 = vpop.permute.xlu0 %467  ;;  %v460_v33 = vpop.permute.xlu1 %459 }
 0x162   : > { %3212 = vmatprep.subr.msk.mxu1 %vm471_vm1, %v468_v32 }
 0x163   : > { %3213 = vmatpush3.xpose.msk.msra.mxu1 %vm471_vm1, %v468_v32 }
 0x164   : > { %3214 = vmatprep.subr.msk.mxu1 %vm471_vm1, %v466_v29 }
 0x165   : > { %v462_v34 = vpop.permute.xlu0 %461  ;;  %v456_v35 = vpop.permute.xlu1 %455 }
 0x167   : > { %3215 = vmatpush3.xpose.msk.msra.mxu1 %vm471_vm1, %v466_v29 }
 0x168   : > { %3216 = vmatprep.subr.msk.mxu1 %vm471_vm1, %v464_v31 }
 0x169   : > { %v458_v36 = vpop.permute.xlu0 %457  ;;  %v721_v37 = vpop.permute.xlu1 %720 }
 0x16a   : > { %3238 = vmatprep.subr.mxu0 %v721_v37 }
 0x16b   : > { %3217 = vmatpush3.xpose.msk.msra.mxu1 %vm471_vm1, %v464_v31  ;;  %3239 = vmatpush3.msra.mxu0 %v721_v37 }
 0x16c   : > { %3218 = vmatprep.subr.msk.mxu1 %vm471_vm1, %v462_v34 }
 0x16d   : > { %v713_v38 = vpop.permute.xlu0 %712  ;;  %v717_v40 = vpop.permute.xlu1 %716 }
 0x16f   : > { %3219 = vmatpush3.xpose.msk.msra.mxu1 %vm471_vm1, %v462_v34 }
 0x170   : > { %3220 = vmatprep.subr.msk.mxu1 %vm471_vm1, %v460_v33 }
 0x171   : > { %v709_v39 = vpop.permute.xlu0 %708  ;;  %v715_v42 = vpop.permute.xlu1 %714 }
 0x173   : > { %3221 = vmatpush3.xpose.msk.msra.mxu1 %vm471_vm1, %v460_v33 }
 0x174   : > { %3222 = vmatprep.subr.msk.mxu1 %vm471_vm1, %v458_v36 }
 0x175   : > { %v3932_v41 = vpop.permute.xlu0 %899  ;;  %v711_v44 = vpop.permute.xlu1 %710 }
 0x177   : > { %3223 = vmatpush3.xpose.msk.msra.mxu1 %vm471_vm1, %v458_v36 }
 0x178   : > { %3224 = vmatprep.subr.msk.mxu1 %vm471_vm1, %v456_v35 }
 0x179   : > { %v719_v43 = vpop.permute.xlu0 %718  ;;  %v707_v45 = vpop.permute.xlu1 %706 }
 0x17a   : > { %3240 = vmatprep.subr.mxu0 %v719_v43 }
 0x17b   : > { %3225 = vmatpush3.xpose.msk.msra.mxu1 %vm471_vm1, %v456_v35  ;;  %3241 = vmatpush3.msra.mxu0 %v719_v43 }
 0x17c   : > { %3242 = vmatprep.subr.mxu0 %v717_v40 }
 0x17d   : > { %3243 = vmatpush3.msra.mxu0 %v717_v40  ;;  %v3989_v14 = vpop.permute.xlu1 %897 }
 0x17e   : > { %3227 = vmatmul.mubr.msk.f32.vlgmr.msra.gmra.mxu1 %vm471_vm1, %v3904_v28  ;;  %3244 = vmatprep.subr.mxu0 %v715_v42 }
 0x17f   : > { %3229 = vmatprep.mubr.msk.f32.mxu1 %vm471_vm1, %v3894_v25  ;;  %3245 = vmatpush3.msra.mxu0 %v715_v42 }
 0x180   : > { %3246 = vmatprep.subr.mxu0 %v713_v38 }
 0x181   : > { %3247 = vmatpush3.msra.mxu0 %v713_v38 }
 0x182   : > { %3230 = vmatmul.mubr.msk.f32.gmra.mxu1 %vm471_vm1, %v3900_v27  ;;  %3248 = vmatprep.subr.mxu0 %v711_v44 }
 0x183   : > { %3232 = vmatprep.mubr.msk.f32.mxu1 %vm471_vm1, %v3888_v22  ;;  %3249 = vmatpush3.msra.mxu0 %v711_v44 }
 0x184   : > { %3250 = vmatprep.subr.mxu0 %v709_v39 }
 0x185   : > { %3251 = vmatpush3.msra.mxu0 %v709_v39 }
 0x186   : > { %3233 = vmatmul.mubr.msk.f32.gmra.mxu1 %vm471_vm1, %v3885_v19  ;;  %3252 = vmatprep.subr.mxu0 %v707_v45 }
 0x187   : > { %3235 = vmatprep.mubr.msk.f32.mxu1 %vm471_vm1, %v3896_v26  ;;  %3253 = vmatpush3.msra.mxu0 %v707_v45 }
 0x188   : > { %3266 = vmatprep.subr.msk.mxu0 %vm471_vm1, %v3932_v41 }
 0x18a   : > { %3236 = vmatmul.mubr.msk.f32.gmra.mxu1 %vm471_vm1, %v3890_v23 }
 0x23e   : > { %v3228_v47 = vpop.f32.mrf.mxu1 }
 0x23f   : > { %v576_v49 = vadd.f32 %v3228_v47, %v440_v46 }
 0x240   : > { %v570_v50 = vpop.f32.mrf.mxu1 }
 0x241   : > { %v571_v52 = vadd.f32 %v570_v50, %v439_v48  ;;  %v613_v53 = vsel %vm609_vm2, %v576_v49, -inf }
 0x242   : > { %614 = vmax.xlane.f32.xlu1 %v613_v53  ;;  %v3231_v54 = vpop.f32.mrf.mxu1 }
 0x243   : > { %v586_v55 = vadd.f32 %v3231_v54, %v442_v51  ;;  %v610_v56 = vsel %vm609_vm2, %v571_v52, -inf }
 0x244   : > { %v580_v57 = vpop.f32.mrf.mxu1  ;;  %611 = vmax.xlane.f32.xlu0 %v610_v56 }
 0x245   : > { %v581_v61 = vadd.f32 %v580_v57, %v441_v58  ;;  %v619_v62 = vsel %vm609_vm2, %v586_v55, -inf }
 0x246   : > { %v3234_v59 = vpop.f32.mrf.mxu1 }
 0x247   : > { %v596_v4 = vadd.f32 %v3234_v59, %v444_v63  ;;  %v616_v6 = vsel %vm609_vm2, %v581_v61, -inf }
 0x248   : > { %v590_v0 = vpop.f32.mrf.mxu1  ;;  %620 = vmax.xlane.f32.xlu0 %v619_v62 }
 0x249   : > { %v591_v1 = vadd.f32 %v590_v0, %v443_v60  ;;  %v625_v12 = vsel %vm609_vm2, %v596_v4, -inf }
 0x24a   : > { %v3237_v2 = vpop.f32.mrf.mxu1 }
 0x24b   : > { %v622_v5 = vsel %vm609_vm2, %v591_v1, -inf  ;;  %v606_v10 = vadd.f32 %v3237_v2, %v446_v7 }
 0x24c   : > { %v600_v8 = vpop.f32.mrf.mxu1  ;;  %623 = vmax.xlane.f32.xlu1 %v622_v5  ;;  %617 = vmax.xlane.f32.xlu0 %v616_v6 }
 0x24d   : > { %v601_v9 = vadd.f32 %v600_v8, %v445_v3  ;;  %v631_v13 = vsel %vm609_vm2, %v606_v10, -inf }
 0x24f   : > { %v628_v11 = vsel %vm609_vm2, %v601_v9, -inf }
 0x250   : > { %629 = vmax.xlane.f32.xlu1 %v628_v11  ;;  %626 = vmax.xlane.f32.xlu0 %v625_v12 }
 0x254   : > { %632 = vmax.xlane.f32.xlu0 %v631_v13 }
 0x261   : > { %893 = vrot.lane.b32.xlu1 %v3888_v22, %s3750_s16 }
 0x26a   : > { %895 = vrot.lane.b32.xlu0 %v3885_v19, %s3750_s16 }
 0x2cb   : > { %v615_v16 = vpop.xlane.xlu1 %614 }
 0x2cc   : > { %v635_v17 = vsub.f32 %v576_v49, %v615_v16 }
 0x2cd   : > { %v612_v18 = vpop.xlane.xlu0 %611 }
 0x2ce   : > { %v644_v20 = vmul.f32 1.442695, %v635_v17  ;;  %v634_v21 = vsub.f32 %v571_v52, %v612_v18 }
 0x2d0   : > { %3558 = vpow2.f32 %v644_v20  ;;  %v642_v24 = vmul.f32 1.442695, %v634_v21 }
 0x2d1   : > { %v621_v33 = vpop.xlane.xlu0 %620 }
 0x2d2   : > { %3560 = vpow2.f32 %v642_v24  ;;  %v637_v38 = vsub.f32 %v586_v55, %v621_v33 }
 0x2d4   : > { %v648_v43 = vmul.f32 1.442695, %v637_v38 }
 0x2d5   : > { %v618_v34 = vpop.xlane.xlu0 %617  ;;  %v624_v35 = vpop.xlane.xlu1 %623 }
 0x2d6   : > { %v636_v36 = vsub.f32 %v581_v61, %v618_v34  ;;  %v638_v39 = vsub.f32 %v591_v1, %v624_v35 }
 0x2d8   : > { %v646_v40 = vmul.f32 1.442695, %v636_v36  ;;  %v650_v46 = vmul.f32 1.442695, %v638_v39 }
 0x2d9   : > { %v627_v37 = vpop.xlane.xlu0 %626  ;;  %v630_v42 = vpop.xlane.xlu1 %629 }
 0x2da   : > { %v639_v44 = vsub.f32 %v596_v4, %v627_v37  ;;  %3562 = vpow2.f32 %v646_v40  ;;  %v640_v47 = vsub.f32 %v601_v9, %v630_v42 }
 0x2db   : > { %3564 = vpow2.f32 %v648_v43 }
 0x2dc   : > { %v652_v48 = vmul.f32 1.442695, %v639_v44  ;;  %3566 = vpow2.f32 %v650_v46  ;;  %v654_v50 = vmul.f32 1.442695, %v640_v47  ;;  %v859_v46 = vld [vmem:[%s4752_s3] sm:$0xff] }
 0x2dd   : > { %v3991_v29 = vpop.eup %3558  ;;  %v633_v45 = vpop.xlane.xlu0 %632 }
 0x2de   : > { %v661_v30 = vsel %vm609_vm2, %v3991_v29, 0.0  ;;  %v641_v49 = vsub.f32 %v606_v10, %v633_v45  ;;  %3568 = vpow2.f32 %v652_v48  ;;  %v894_v1 = vpop.permute.xlu1 %893 }
 0x2df   : > { %v3995_v31 = vpop.eup %3560  ;;  %662 = vadd.xlane.f32.xlu0 %v661_v30  ;;  %3570 = vpow2.f32 %v654_v50 }
 0x2e0   : > { %v658_v32 = vsel %vm609_vm2, %v3995_v31, 0.0  ;;  %v656_v51 = vmul.f32 1.442695, %v641_v49 }
 0x2e1   : > { %659 = vadd.xlane.f32.xlu1 %v658_v32  ;;  %v896_v0 = vpop.permute.xlu0 %895 }
 0x2e2   : > { %3572 = vpow2.f32 %v656_v51 }
 0x2e7   : > { %v4003_v52 = vpop.eup %3562 }
 0x2e8   : > { %v4005_v53 = vpop.eup %3564  ;;  %v664_v54 = vsel %vm609_vm2, %v4003_v52, 0.0 }
 0x2e9   : > { %v4009_v55 = vpop.eup %3566  ;;  %v667_v56 = vsel %vm609_vm2, %v4005_v53, 0.0 }
 0x2ea   : > { %v670_v58 = vsel %vm609_vm2, %v4009_v55, 0.0 }
 0x2eb   : > { %v4013_v57 = vpop.eup %3568 }
 0x2ec   : > { %v4017_v59 = vpop.eup %3570  ;;  %v673_v60 = vsel %vm609_vm2, %v4013_v57, 0.0 }
 0x2ed   : > { %v676_v62 = vsel %vm609_vm2, %v4017_v59, 0.0 }
 0x2ef   : > { %v4021_v61 = vpop.eup %3572 }
 0x2f0   : > { %v679_v63 = vsel %vm609_vm2, %v4021_v61, 0.0 }
 0x2f2   : > { %889 = vrot.lane.b32.xlu1 %v3894_v25, %s3750_s16 }
 0x2f5   : > { %891 = vrot.lane.b32.xlu0 %v3900_v27, %s3750_s16 }
 0x314   : > { %665 = vadd.xlane.f32.xlu0 %v664_v54 }
 0x316   : > { %668 = vadd.xlane.f32.xlu1 %v667_v56 }
 0x318   : > { %671 = vadd.xlane.f32.xlu0 %v670_v58 }
 0x31a   : > { %674 = vadd.xlane.f32.xlu1 %v673_v60 }
 0x31c   : > { %677 = vadd.xlane.f32.xlu0 %v676_v62  ;;  %v2856_v62 = vld [vmem:[%s4754_s5 + $0x58] sm:$0xff] }
 0x31e   : > { %680 = vadd.xlane.f32.xlu1 %v679_v63 }
 0x32f   : > { %885 = vrot.lane.b32.xlu1 %v3881_v15, %s3750_s16 }
 0x332   : > { %887 = vrot.lane.b32.xlu0 %v3904_v28, %s3750_s16  ;;  %s3012_s16 = sshll.u32 %s3861_s19, 8  ;;  %s3757_s19 = smov 48  }
 0x333   : > { %871 = vrot.lane.b32.xlu1 %v3904_v28, %s3751_s22  ;;  %s4049_s9 = scalar_lea.vmem %s4756_s7, %s3012_s16 }
 0x336   : > { %869 = vrot.lane.b32.xlu0 %v3881_v15, %s3751_s22 }
 0x337   : > { %875 = vrot.lane.b32.xlu1 %v3900_v27, %s3751_s22 }
 0x33a   : > { %873 = vrot.lane.b32.xlu0 %v3894_v25, %s3751_s22 }
 0x33b   : > { %879 = vrot.lane.b32.xlu1 %v3885_v19, %s3751_s22 }
 0x33e   : > { %877 = vrot.lane.b32.xlu0 %v3888_v22, %s3751_s22 }
 0x33f   : > { %883 = vrot.lane.b32.xlu1 %v3890_v23, %s3751_s22 }
 0x342   : > { %881 = vrot.lane.b32.xlu0 %v3896_v26, %s3751_s22  ;;  %s3756_s22 = smov 104  }
 0x343   : > { %1149 = vrot.lane.b32.xlu1 %v3890_v23, %s3752_s23 }
 0x346   : > { %1147 = vrot.lane.b32.xlu0 %v3896_v26, %s3752_s23 }
 0x34a   : > { %1143 = vrot.lane.b32.xlu0 %v3888_v22, %s3752_s23 }
 0x368   : > { %v663_v2 = vpop.xlane.xlu0 %662 }
 0x369   : > { %3574 = vrcp.f32 %v663_v2 }
 0x36a   : > { %v660_v3 = vpop.xlane.xlu1 %659 }
 0x36b   : > { %3576 = vrcp.f32 %v660_v3 }
 0x36c   : > { %v892_v8 = vpop.permute.xlu0 %891 }
 0x36e   : > { %v890_v9 = vpop.permute.xlu1 %889 }
 0x376   : > { %v3575_v4 = vpop.eup %3574 }
 0x377   : > { %v691_v5 = vmul.f32 %v3575_v4, %v3991_v29 }
 0x378   : > { %v3577_v6 = vpop.eup %3576 }
 0x379   : > { %699 = vst.msk [vmem:[%s4049_s9 + $0x8] sm:$0xff] %vm609_vm2, %v691_v5  ;;  %v690_v7 = vmul.f32 %v3577_v6, %v3995_v31 }
 0x37b   : > { %698 = vst.msk [vmem:[%s4049_s9] sm:$0xff] %vm609_vm2, %v690_v7  ;;  %3254 = vmatprep.mubr.msk.f32.mxu0 %vm609_vm2, %v690_v7 }
 0x37c   : > { %3255 = vmatmul.mubr.msk.f32.vlgmr.msra.gmra.mxu0 %vm609_vm2, %v691_v5  ;;  %v2855_v5 = vld [vmem:[%s4754_s5 + $0x50] sm:$0xff] }
 0x37d   : > { %3267 = vmatpush3.xpose.msk.msra.mxu0 %vm471_vm1, %v3932_v41 }
 0x37e   : > { %3268 = vmatprep.subr.msk.mxu0 %vm471_vm1, %v3989_v14 }
 0x381   : > { %3269 = vmatpush3.xpose.msk.msra.mxu0 %vm471_vm1, %v3989_v14 }
 0x382   : > { %3270 = vmatprep.subr.msk.mxu0 %vm471_vm1, %v896_v0 }
 0x385   : > { %3271 = vmatpush3.xpose.msk.msra.mxu0 %vm471_vm1, %v896_v0 }
 0x386   : > { %3272 = vmatprep.subr.msk.mxu0 %vm471_vm1, %v894_v1 }
 0x389   : > { %3273 = vmatpush3.xpose.msk.msra.mxu0 %vm471_vm1, %v894_v1 }
 0x38a   : > { %3274 = vmatprep.subr.msk.mxu0 %vm471_vm1, %v892_v8 }
 0x38d   : > { %3275 = vmatpush3.xpose.msk.msra.mxu0 %vm471_vm1, %v892_v8 }
 0x38e   : > { %3276 = vmatprep.subr.msk.mxu0 %vm471_vm1, %v890_v9 }
 0x391   : > { %3277 = vmatpush3.xpose.msk.msra.mxu0 %vm471_vm1, %v890_v9  ;;  %v2858_v9 = vld [vmem:[%s4754_s5 + $0x68] sm:$0xff] }
 0x39d   : > { %v666_v41 = vpop.xlane.xlu0 %665 }
 0x39e   : > { %3578 = vrcp.f32 %v666_v41 }
 0x39f   : > { %v669_v10 = vpop.xlane.xlu1 %668 }
 0x3a0   : > { %3580 = vrcp.f32 %v669_v10 }
 0x3a1   : > { %v672_v11 = vpop.xlane.xlu0 %671 }
 0x3a2   : > { %3582 = vrcp.f32 %v672_v11 }
 0x3a3   : > { %v675_v12 = vpop.xlane.xlu1 %674 }
 0x3a4   : > { %3584 = vrcp.f32 %v675_v12  ;;  %v2860_v12 = vld [vmem:[%s4754_s5 + $0x78] sm:$0xff] }
 0x3a5   : > { %v678_v13 = vpop.xlane.xlu0 %677 }
 0x3a6   : > { %3586 = vrcp.f32 %v678_v13 }
 0x3a7   : > { %v681_v14 = vpop.xlane.xlu1 %680 }
 0x3a8   : > { %3588 = vrcp.f32 %v681_v14 }
 0x3a9   : > { %v888_v16 = vpop.permute.xlu0 %887 }
 0x3aa   : > { %3278 = vmatprep.subr.msk.mxu0 %vm471_vm1, %v888_v16 }
 0x3ab   : > { %v3579_v17 = vpop.eup %3578  ;;  %v886_v18 = vpop.permute.xlu1 %885  ;;  %3279 = vmatpush3.xpose.msk.msra.mxu0 %vm471_vm1, %v888_v16 }
 0x3ac   : > { %3280 = vmatprep.subr.msk.mxu0 %vm471_vm1, %v886_v18  ;;  %v692_v20 = vmul.f32 %v3579_v17, %v4003_v52 }
 0x3ad   : > { %v3581_v21 = vpop.eup %3580  ;;  %v870_v24 = vpop.permute.xlu0 %869 }
 0x3ae   : > { %700 = vst.msk [vmem:[%s4049_s9 + $0x10] sm:$0xff] %vm609_vm2, %v692_v20  ;;  %3257 = vmatprep.mubr.msk.f32.mxu0 %vm609_vm2, %v692_v20  ;;  %v693_v29 = vmul.f32 %v3581_v21, %v4005_v53 }
 0x3af   : > { %v3583_v30 = vpop.eup %3582  ;;  %v872_v31 = vpop.permute.xlu1 %871  ;;  %3281 = vmatpush3.xpose.msk.msra.mxu0 %vm471_vm1, %v886_v18  ;;  %v2857_v18 = vld [vmem:[%s4754_s5 + $0x60] sm:$0xff] }
 0x3b0   : > { %701 = vst.msk [vmem:[%s4049_s9 + $0x18] sm:$0xff] %vm609_vm2, %v693_v29  ;;  %3258 = vmatmul.mubr.msk.f32.gmra.mxu0 %vm609_vm2, %v693_v29  ;;  %v694_v32 = vmul.f32 %v3583_v30, %v4009_v55  ;;  %3336 = vmatprep.subr.mxu0 %v859_v46 }
 0x3b1   : > { %v3585_v33 = vpop.eup %3584  ;;  %v874_v34 = vpop.permute.xlu0 %873 }
 0x3b2   : > { %702 = vst.msk [vmem:[%s4049_s9 + $0x20] sm:$0xff] %vm609_vm2, %v694_v32  ;;  %3260 = vmatprep.mubr.msk.f32.mxu0 %vm609_vm2, %v694_v32  ;;  %v695_v35 = vmul.f32 %v3585_v33, %v4013_v57  ;;  %v2854_v57 = vld [vmem:[%s4754_s5 + $0x48] sm:$0xff] }
 0x3b3   : > { %v3587_v36 = vpop.eup %3586  ;;  %v876_v37 = vpop.permute.xlu1 %875 }
 0x3b4   : > { %703 = vst.msk [vmem:[%s4049_s9 + $0x28] sm:$0xff] %vm609_vm2, %v695_v35  ;;  %3261 = vmatmul.mubr.msk.f32.gmra.mxu0 %vm609_vm2, %v695_v35  ;;  %v696_v38 = vmul.f32 %v3587_v36, %v4017_v59  ;;  %v2853_v59 = vld [vmem:[%s4754_s5 + $0x40] sm:$0xff] }
 0x3b5   : > { %v3589_v39 = vpop.eup %3588  ;;  %v878_v40 = vpop.permute.xlu0 %877 }
 0x3b6   : > { %704 = vst.msk [vmem:[%s4049_s9 + $0x30] sm:$0xff] %vm609_vm2, %v696_v38  ;;  %3263 = vmatprep.mubr.msk.f32.mxu0 %vm609_vm2, %v696_v38  ;;  %v697_v42 = vmul.f32 %v3589_v39, %v4021_v61 }
 0x3b7   : > { %v880_v43 = vpop.permute.xlu1 %879 }
 0x3b8   : > { %705 = vst.msk [vmem:[%s4049_s9 + $0x38] sm:$0xff] %vm609_vm2, %v697_v42  ;;  %3264 = vmatmul.mubr.msk.f32.gmra.mxu0 %vm609_vm2, %v697_v42 }
 0x3b9   : > { %3282 = vmatprep.mubr.msk.f32.mxu0 %vm471_vm1, %v870_v24  ;;  %v882_v44 = vpop.permute.xlu0 %881  ;;  %v2859_v24 = vld [vmem:[%s4754_s5 + $0x70] sm:$0xff] }
 0x3bb   : > { %v884_v45 = vpop.permute.xlu1 %883 }
 0x3bc   : > { %3283 = vmatmul.mubr.msk.f32.vlgmr.msra.gmra.mxu0 %vm471_vm1, %v872_v31 }
 0x3bd   : > { %3285 = vmatprep.mubr.msk.f32.mxu0 %vm471_vm1, %v874_v34  ;;  %v1148_v48 = vpop.permute.xlu0 %1147  ;;  %3337 = vmatpush3.msra.mxu0 %v859_v46 }
 0x3bf   : > { %v1150_v47 = vpop.permute.xlu1 %1149 }
 0x3c0   : > { %3286 = vmatmul.mubr.msk.f32.gmra.mxu0 %vm471_vm1, %v876_v37  ;;  %3294 = vmatprep.subr.mxu1 %v1150_v47 }
 0x3c1   : > { %3288 = vmatprep.mubr.msk.f32.mxu0 %vm471_vm1, %v878_v40  ;;  %3295 = vmatpush3.msra.mxu1 %v1150_v47  ;;  %v1144_v32 = vpop.permute.xlu0 %1143 }
 0x3c2   : > { %3296 = vmatprep.subr.mxu1 %v1148_v48 }
 0x3c3   : > { %3297 = vmatpush3.msra.mxu1 %v1148_v48 }
 0x3c4   : > { %3289 = vmatmul.mubr.msk.f32.gmra.mxu0 %vm471_vm1, %v880_v43 }
 0x3c5   : > { %3291 = vmatprep.mubr.msk.f32.mxu0 %vm471_vm1, %v882_v44 }
 0x3c8   : > { %3292 = vmatmul.mubr.msk.f32.gmra.mxu0 %vm471_vm1, %v884_v45 }
 0x43c   : > { %v3256_v49 = vpop.f32.mrf.mxu0 }
 0x43e   : > { %v820_v50 = vpop.f32.mrf.mxu0 }
 0x43f   : > { %3338 = vmatprep.mubr.msk.f32.mxu0 %vm471_vm1, %v820_v50 }
 0x440   : > { %3339 = vmatmul.mubr.msk.f32.vlgmr.msra.gmra.mxu0 %vm471_vm1, %v3256_v49 }
 0x470   : > { %v3259_v51 = vpop.f32.mrf.mxu0 }
 0x472   : > { %v830_v52 = vpop.f32.mrf.mxu0 }
 0x473   : > { %3341 = vmatprep.mubr.msk.f32.mxu0 %vm471_vm1, %v830_v52 }
 0x474   : > { %v3262_v53 = vpop.f32.mrf.mxu0  ;;  %3342 = vmatmul.mubr.msk.f32.gmra.mxu0 %vm471_vm1, %v3259_v51 }
 0x476   : > { %v840_v54 = vpop.f32.mrf.mxu0 }
 0x477   : > { %3344 = vmatprep.mubr.msk.f32.mxu0 %vm471_vm1, %v840_v54 }
 0x478   : > { %v3265_v55 = vpop.f32.mrf.mxu0  ;;  %3345 = vmatmul.mubr.msk.f32.gmra.mxu0 %vm471_vm1, %v3262_v53 }
 0x47a   : > { %v850_v56 = vpop.f32.mrf.mxu0 }
 0x47b   : > { %3347 = vmatprep.mubr.msk.f32.mxu0 %vm471_vm1, %v850_v56 }
 0x47c   : > { %v3284_v58 = vpop.f32.mrf.mxu0  ;;  %3348 = vmatmul.mubr.msk.f32.gmra.mxu0 %vm471_vm1, %v3265_v55 }
 0x47d   : > { %v1005_v60 = vadd.f32 %v3284_v58, %v2854_v57 }
 0x47e   : > { %v999_v61 = vpop.f32.mrf.mxu0 }
 0x47f   : > { %v1000_v63 = vadd.f32 %v2853_v59, %v999_v61  ;;  %v1041_v0 = vsel %vm609_vm2, %v1005_v60, -inf }
 0x480   : > { %1042 = vmax.xlane.f32.xlu1 %v1041_v0  ;;  %v3287_v1 = vpop.f32.mrf.mxu0 }
 0x481   : > { %v4130_v2 = vadd.f32 %v3287_v1, %v2856_v62  ;;  %v1038_v3 = vsel %vm609_vm2, %v1000_v63, -inf }
 0x482   : > { %1039 = vmax.xlane.f32.xlu0 %v1038_v3  ;;  %v1009_v4 = vpop.f32.mrf.mxu0 }
 0x483   : > { %v1010_v7 = vadd.f32 %v2855_v5, %v1009_v4  ;;  %v1047_v8 = vsel %vm609_vm2, %v4130_v2, -inf }
 0x484   : > { %v3290_v6 = vpop.f32.mrf.mxu0 }
 0x485   : > { %v1025_v10 = vadd.f32 %v3290_v6, %v2858_v9  ;;  %v1044_v11 = vsel %vm609_vm2, %v1010_v7, -inf }
 0x486   : > { %1048 = vmax.xlane.f32.xlu0 %v1047_v8  ;;  %v1019_v41 = vpop.f32.mrf.mxu0 }
 0x487   : > { %v1053_v16 = vsel %vm609_vm2, %v1025_v10, -inf  ;;  %v1020_v20 = vadd.f32 %v2857_v18, %v1019_v41 }
 0x488   : > { %v3293_v13 = vpop.f32.mrf.mxu0 }
 0x489   : > { %v4145_v14 = vadd.f32 %v3293_v13, %v2860_v12  ;;  %v1050_v30 = vsel %vm609_vm2, %v1020_v20, -inf }
 0x48a   : > { %1045 = vmax.xlane.f32.xlu0 %v1044_v11  ;;  %v1029_v21 = vpop.f32.mrf.mxu0 }
 0x48b   : > { %v1059_v17 = vsel %vm609_vm2, %v4145_v14, -inf  ;;  %v1030_v29 = vadd.f32 %v2859_v24, %v1029_v21 }
 0x48d   : > { %v1056_v31 = vsel %vm609_vm2, %v1030_v29, -inf }
 0x48e   : > { %1054 = vmax.xlane.f32.xlu0 %v1053_v16 }
 0x491   : > { %1145 = vrot.lane.b32.xlu1 %v3885_v19, %s3752_s23 }
 0x492   : > { %1060 = vmax.xlane.f32.xlu0 %v1059_v17 }
 0x4a8   : > { %1139 = vrot.lane.b32.xlu0 %v3894_v25, %s3752_s23 }
 0x4b5   : > { %1051 = vmax.xlane.f32.xlu1 %v1050_v30  ;;  %v1288_v30 = vld [vmem:[%s4752_s3 + $0x8] sm:$0xff] }
 0x4b9   : > { %1057 = vmax.xlane.f32.xlu1 %v1056_v31 }
 0x4ca   : > { %1141 = vrot.lane.b32.xlu1 %v3900_v27, %s3752_s23 }
 0x509   : > { %v1043_v33 = vpop.xlane.xlu1 %1042 }
 0x50a   : > { %v1063_v34 = vsub.f32 %v1005_v60, %v1043_v33 }
 0x50b   : > { %v1040_v35 = vpop.xlane.xlu0 %1039 }
 0x50c   : > { %v1072_v36 = vmul.f32 1.442695, %v1063_v34  ;;  %v1062_v37 = vsub.f32 %v1000_v63, %v1040_v35 }
 0x50d   : > { %v1146_v38 = vpop.permute.xlu1 %1145 }
 0x50e   : > { %3590 = vpow2.f32 %v1072_v36  ;;  %v1070_v39 = vmul.f32 1.442695, %v1062_v37  ;;  %3298 = vmatprep.subr.mxu1 %v1146_v38 }
 0x50f   : > { %3299 = vmatpush3.msra.mxu1 %v1146_v38  ;;  %v1049_v40 = vpop.xlane.xlu0 %1048 }
 0x510   : > { %3592 = vpow2.f32 %v1070_v39  ;;  %3300 = vmatprep.subr.mxu1 %v1144_v32  ;;  %v1065_v56 = vsub.f32 %v4130_v2, %v1049_v40 }
 0x511   : > { %3301 = vmatpush3.msra.mxu1 %v1144_v32 }
 0x512   : > { %v1076_v57 = vmul.f32 1.442695, %v1065_v56 }
 0x513   : > { %v1046_v42 = vpop.xlane.xlu0 %1045 }
 0x514   : > { %v1064_v43 = vsub.f32 %v1010_v7, %v1046_v42 }
 0x516   : > { %v1074_v44 = vmul.f32 1.442695, %v1064_v43 }
 0x517   : > { %v1055_v45 = vpop.xlane.xlu0 %1054 }
 0x518   : > { %3594 = vpow2.f32 %v1074_v44  ;;  %v1067_v46 = vsub.f32 %v1025_v10, %v1055_v45 }
 0x51a   : > { %v1080_v47 = vmul.f32 1.442695, %v1067_v46 }
 0x51b   : > { %v4164_v48 = vpop.eup %3590  ;;  %v1061_v61 = vpop.xlane.xlu0 %1060 }
 0x51c   : > { %3596 = vpow2.f32 %v1080_v47  ;;  %v1089_v49 = vsel %vm609_vm2, %v4164_v48, 0.0  ;;  %v1069_v0 = vsub.f32 %v4145_v14, %v1061_v61 }
 0x51d   : > { %v4168_v50 = vpop.eup %3592  ;;  %1090 = vadd.xlane.f32.xlu0 %v1089_v49  ;;  %3598 = vpow2.f32 %v1076_v57 }
 0x51e   : > { %v1086_v51 = vsel %vm609_vm2, %v4168_v50, 0.0  ;;  %v1084_v4 = vmul.f32 1.442695, %v1069_v0 }
 0x51f   : > { %1087 = vadd.xlane.f32.xlu1 %v1086_v51  ;;  %v1140_v3 = vpop.permute.xlu0 %1139 }
 0x525   : > { %v4172_v52 = vpop.eup %3594 }
 0x526   : > { %v1092_v53 = vsel %vm609_vm2, %v4172_v52, 0.0 }
 0x527   : > { %1093 = vadd.xlane.f32.xlu1 %v1092_v53 }
 0x529   : > { %v4176_v54 = vpop.eup %3596 }
 0x52a   : > { %v1101_v55 = vsel %vm609_vm2, %v4176_v54, 0.0  ;;  %v4194_v5 = vpop.eup %3598 }
 0x52b   : > { %1102 = vadd.xlane.f32.xlu1 %v1101_v55  ;;  %v1095_v6 = vsel %vm609_vm2, %v4194_v5, 0.0 }
 0x533   : > { %1137 = vrot.lane.b32.xlu0 %v3904_v28, %s3752_s23 }
 0x53c   : > { %1135 = vrot.lane.b32.xlu1 %v3881_v15, %s3752_s23  ;;  %s3754_s23 = smov 112  }
 0x53e   : > { %v1052_v58 = vpop.xlane.xlu1 %1051 }
 0x53f   : > { %v1066_v59 = vsub.f32 %v1020_v20, %v1052_v58 }
 0x540   : > { %1584 = vrot.lane.b32.xlu1 %v3896_v26, %s3753_s20 }
 0x541   : > { %v1078_v60 = vmul.f32 1.442695, %v1066_v59 }
 0x542   : > { %v1058_v62 = vpop.xlane.xlu1 %1057 }
 0x543   : > { %v1068_v63 = vsub.f32 %v1030_v29, %v1058_v62  ;;  %3600 = vpow2.f32 %v1078_v60 }
 0x544   : > { %1582 = vrot.lane.b32.xlu1 %v3885_v19, %s3753_s20 }
 0x545   : > { %v1082_v1 = vmul.f32 1.442695, %v1068_v63 }
 0x546   : > { %v1142_v2 = vpop.permute.xlu1 %1141 }
 0x547   : > { %3302 = vmatprep.subr.mxu1 %v1142_v2  ;;  %3602 = vpow2.f32 %v1082_v1 }
 0x548   : > { %3303 = vmatpush3.msra.mxu1 %v1142_v2  ;;  %1580 = vrot.lane.b32.xlu1 %v3888_v22, %s3753_s20  ;;  %3604 = vpow2.f32 %v1084_v4 }
 0x549   : > { %3304 = vmatprep.subr.mxu1 %v1140_v3 }
 0x54a   : > { %3305 = vmatpush3.msra.mxu1 %v1140_v3 }
 0x54c   : > { %1578 = vrot.lane.b32.xlu1 %v3900_v27, %s3753_s20 }
 0x550   : > { %1576 = vrot.lane.b32.xlu1 %v3894_v25, %s3753_s20  ;;  %v4200_v7 = vpop.eup %3600 }
 0x551   : > { %v1098_v8 = vsel %vm609_vm2, %v4200_v7, 0.0 }
 0x552   : > { %1096 = vadd.xlane.f32.xlu0 %v1095_v6 }
 0x554   : > { %1572 = vrot.lane.b32.xlu1 %v3881_v15, %s3753_s20  ;;  %v4206_v9 = vpop.eup %3602 }
 0x555   : > { %v1104_v41 = vsel %vm609_vm2, %v4206_v9, 0.0  ;;  %v4211_v10 = vpop.eup %3604 }
 0x556   : > { %1099 = vadd.xlane.f32.xlu0 %v1098_v8  ;;  %v1107_v11 = vsel %vm609_vm2, %v4211_v10, 0.0 }
 0x558   : > { %1558 = vrot.lane.b32.xlu1 %v3904_v28, %s3754_s23 }
 0x55a   : > { %1105 = vadd.xlane.f32.xlu0 %v1104_v41 }
 0x55c   : > { %1562 = vrot.lane.b32.xlu1 %v3900_v27, %s3754_s23 }
 0x55e   : > { %1108 = vadd.xlane.f32.xlu0 %v1107_v11 }
 0x560   : > { %1566 = vrot.lane.b32.xlu1 %v3885_v19, %s3754_s23 }
 0x564   : > { %1570 = vrot.lane.b32.xlu1 %v3890_v23, %s3754_s23 }
 0x568   : > { %2150 = vrot.lane.b32.xlu1 %v3896_v26, %s3755_s21 }
 0x56c   : > { %2146 = vrot.lane.b32.xlu1 %v3888_v22, %s3755_s21 }
 0x570   : > { %2142 = vrot.lane.b32.xlu1 %v3894_v25, %s3755_s21 }
 0x574   : > { %2138 = vrot.lane.b32.xlu1 %v3881_v15, %s3755_s21  ;;  %1586 = vrot.lane.b32.xlu0 %v3890_v23, %s3753_s20 }
 0x578   : > { %2124 = vrot.lane.b32.xlu1 %v3904_v28, %s3756_s22  ;;  %1574 = vrot.lane.b32.xlu0 %v3904_v28, %s3753_s20  ;;  %s4701_s20 = scalar_lea.hbm %s4755_s6, %s3013_s15 }
 0x57c   : > { %2128 = vrot.lane.b32.xlu1 %v3900_v27, %s3756_s22  ;;  %1556 = vrot.lane.b32.xlu0 %v3881_v15, %s3754_s23 }
 0x580   : > { %2132 = vrot.lane.b32.xlu1 %v3885_v19, %s3756_s22  ;;  %1560 = vrot.lane.b32.xlu0 %v3894_v25, %s3754_s23 }
 0x584   : > { %2136 = vrot.lane.b32.xlu1 %v3890_v23, %s3756_s22  ;;  %1564 = vrot.lane.b32.xlu0 %v3888_v22, %s3754_s23 }
 0x588   : > { %1568 = vrot.lane.b32.xlu0 %v3896_v26, %s3754_s23 }
 0x58c   : > { %2152 = vrot.lane.b32.xlu0 %v3890_v23, %s3755_s21 }
 0x590   : > { %2148 = vrot.lane.b32.xlu0 %v3885_v19, %s3755_s21 }
 0x594   : > { %2144 = vrot.lane.b32.xlu0 %v3900_v27, %s3755_s21 }
 0x598   : > { %2140 = vrot.lane.b32.xlu0 %v3904_v28, %s3755_s21  ;;  %s3759_s21 = smov [#allocation2]  }
 0x59c   : > { %2122 = vrot.lane.b32.xlu0 %v3881_v15, %s3756_s22 }
 0x5a0   : > { %2126 = vrot.lane.b32.xlu0 %v3894_v25, %s3756_s22 }
 0x5a4   : > { %2130 = vrot.lane.b32.xlu0 %v3888_v22, %s3756_s22 }
 0x5a6   : > { %v1091_v12 = vpop.xlane.xlu0 %1090 }
 0x5a7   : > { %3606 = vrcp.f32 %v1091_v12 }
 0x5a8   : > { %v1088_v13 = vpop.xlane.xlu1 %1087  ;;  %2134 = vrot.lane.b32.xlu0 %v3896_v26, %s3756_s22  ;;  %s3690_s22 = sshll.u32 %s3759_s21, 4  ;;  %s3691_s22 = int_to_ptr.vmem [resolvable:$false] %s3690_s22 }
 0x5a9   : > { %3608 = vrcp.f32 %v1088_v13  ;;  %s3692_s16 = scalar_lea.vmem %s3691_s22, 2048 }
 0x5aa   : > { %v1138_v14 = vpop.permute.xlu0 %1137 }
 0x5ab   : > { %3306 = vmatprep.subr.mxu1 %v1138_v14 }
 0x5ac   : > { %3307 = vmatpush3.msra.mxu1 %v1138_v14 }
 0x5b0   : > { %v1094_v16 = vpop.xlane.xlu1 %1093 }
 0x5b1   : > { %3610 = vrcp.f32 %v1094_v16 }
 0x5b4   : > { %v3607_v17 = vpop.eup %3606  ;;  %v1103_v18 = vpop.xlane.xlu1 %1102 }
 0x5b5   : > { %v1119_v20 = vmul.f32 %v3607_v17, %v4164_v48  ;;  %3612 = vrcp.f32 %v1103_v18 }
 0x5b6   : > { %v3609_v21 = vpop.eup %3608 }
 0x5b7   : > { %2878 = vst.msk [vmem:[%s4049_s9 + $0x48] sm:$0xff] %vm609_vm2, %v1119_v20  ;;  %v1118_v24 = vmul.f32 %v3609_v21, %v4168_v50 }
 0x5b8   : > { %v1136_v29 = vpop.permute.xlu1 %1135 }
 0x5b9   : > { %3308 = vmatprep.subr.mxu1 %v1136_v29  ;;  %2877 = vst.msk [vmem:[%s4049_s9 + $0x40] sm:$0xff] %vm609_vm2, %v1118_v24  ;;  %3310 = vmatprep.mubr.msk.f32.mxu1 %vm609_vm2, %v1118_v24 }
 0x5ba   : > { %3309 = vmatpush3.msra.mxu1 %v1136_v29 }
 0x5bb   : > { %3311 = vmatmul.mubr.msk.f32.vlgmr.msra.gmra.mxu1 %vm609_vm2, %v1119_v20  ;;  %3322 = vmatprep.subr.mxu1 %v1288_v30 }
 0x5bc   : > { %3323 = vmatpush3.msra.mxu1 %v1288_v30  ;;  %v1585_v49 = vpop.permute.xlu1 %1584 }
 0x5be   : > { %v3611_v31 = vpop.eup %3610 }
 0x5bf   : > { %v1120_v32 = vmul.f32 %v3611_v31, %v4172_v52 }
 0x5c0   : > { %v1583_v52 = vpop.permute.xlu1 %1582 }
 0x5c1   : > { %2879 = vst.msk [vmem:[%s4049_s9 + $0x50] sm:$0xff] %vm609_vm2, %v1120_v32  ;;  %3313 = vmatprep.mubr.msk.f32.mxu1 %vm609_vm2, %v1120_v32 }
 0x5c2   : > { %v3613_v33 = vpop.eup %3612 }
 0x5c3   : > { %v1123_v34 = vmul.f32 %v3613_v33, %v4176_v54 }
 0x5c4   : > { %v1581_v54 = vpop.permute.xlu1 %1580 }
 0x5c5   : > { %2882 = vst.msk [vmem:[%s4049_s9 + $0x68] sm:$0xff] %vm609_vm2, %v1123_v34 }
 0x5c8   : > { %v1579_v56 = vpop.permute.xlu1 %1578 }
 0x5cc   : > { %v1577_v58 = vpop.permute.xlu1 %1576 }
 0x5d0   : > { %v1573_v61 = vpop.permute.xlu1 %1572 }
 0x5d4   : > { %v1559_v63 = vpop.permute.xlu1 %1558 }
 0x5d8   : > { %v1563_v2 = vpop.permute.xlu1 %1562 }
 0x5db   : > { %v1097_v35 = vpop.xlane.xlu0 %1096 }
 0x5dc   : > { %3614 = vrcp.f32 %v1097_v35 }
 0x5df   : > { %v1100_v36 = vpop.xlane.xlu0 %1099 }
 0x5e0   : > { %3616 = vrcp.f32 %v1100_v36 }
 0x5e3   : > { %v1106_v37 = vpop.xlane.xlu0 %1105 }
 0x5e4   : > { %3618 = vrcp.f32 %v1106_v37 }
 0x5e7   : > { %v1109_v38 = vpop.xlane.xlu0 %1108 }
 0x5e8   : > { %3620 = vrcp.f32 %v1109_v38 }
 0x5e9   : > { %v3615_v39 = vpop.eup %3614 }
 0x5ea   : > { %v1121_v40 = vmul.f32 %v3615_v39, %v4194_v5  ;;  %v1567_v5 = vpop.permute.xlu1 %1566  ;;  %v2910_v39 = vld [vmem:[%s4754_s5 + $0x88] sm:$0xff] }
 0x5eb   : > { %v1587_v42 = vpop.permute.xlu0 %1586 }
 0x5ec   : > { %2880 = vst.msk [vmem:[%s4049_s9 + $0x58] sm:$0xff] %vm609_vm2, %v1121_v40  ;;  %3314 = vmatmul.mubr.msk.f32.gmra.mxu1 %vm609_vm2, %v1121_v40  ;;  %3350 = vmatprep.subr.msk.mxu1 %vm471_vm1, %v1587_v42 }
 0x5ed   : > { %v3617_v43 = vpop.eup %3616 }
 0x5ee   : > { %v1122_v44 = vmul.f32 %v3617_v43, %v4200_v7 }
 0x5ef   : > { %v1575_v53 = vpop.permute.xlu0 %1574 }
 0x5f0   : > { %2881 = vst.msk [vmem:[%s4049_s9 + $0x60] sm:$0xff] %vm609_vm2, %v1122_v44  ;;  %3316 = vmatprep.mubr.msk.f32.mxu1 %vm609_vm2, %v1122_v44 }
 0x5f1   : > { %v3619_v45 = vpop.eup %3618  ;;  %3317 = vmatmul.mubr.msk.f32.gmra.mxu1 %vm609_vm2, %v1123_v34 }
 0x5f2   : > { %v1124_v46 = vmul.f32 %v3619_v45, %v4206_v9  ;;  %v1571_v9 = vpop.permute.xlu1 %1570 }
 0x5f3   : > { %v1557_v55 = vpop.permute.xlu0 %1556 }
 0x5f4   : > { %2883 = vst.msk [vmem:[%s4049_s9 + $0x70] sm:$0xff] %vm609_vm2, %v1124_v46  ;;  %3319 = vmatprep.mubr.msk.f32.mxu1 %vm609_vm2, %v1124_v46 }
 0x5f5   : > { %v3621_v47 = vpop.eup %3620 }
 0x5f6   : > { %v1125_v48 = vmul.f32 %v3621_v47, %v4211_v10  ;;  %v2151_v10 = vpop.permute.xlu1 %2150 }
 0x5f7   : > { %v1561_v57 = vpop.permute.xlu0 %1560 }
 0x5f8   : > { %2884 = vst.msk [vmem:[%s4049_s9 + $0x78] sm:$0xff] %vm609_vm2, %v1125_v48  ;;  %3320 = vmatmul.mubr.msk.f32.gmra.mxu1 %vm609_vm2, %v1125_v48  ;;  %v2911_v48 = vld [vmem:[%s4754_s5 + $0x90] sm:$0xff] }
 0x5fa   : > { %v2147_v12 = vpop.permute.xlu1 %2146 }
 0x5fb   : > { %v1565_v59 = vpop.permute.xlu0 %1564 }
 0x5fe   : > { %v2143_v14 = vpop.permute.xlu1 %2142 }
 0x5ff   : > { %v1569_v60 = vpop.permute.xlu0 %1568 }
 0x602   : > { %v2139_v16 = vpop.permute.xlu1 %2138 }
 0x603   : > { %v2153_v62 = vpop.permute.xlu0 %2152 }
 0x606   : > { %v2125_v17 = vpop.permute.xlu1 %2124 }
 0x607   : > { %v2149_v7 = vpop.permute.xlu0 %2148 }
 0x60a   : > { %v2129_v20 = vpop.permute.xlu1 %2128 }
 0x60b   : > { %v2145_v41 = vpop.permute.xlu0 %2144 }
 0x60e   : > { %v2133_v24 = vpop.permute.xlu1 %2132 }
 0x60f   : > { %v2141_v11 = vpop.permute.xlu0 %2140 }
 0x612   : > { %v2137_v30 = vpop.permute.xlu1 %2136 }
 0x613   : > { %v2123_v13 = vpop.permute.xlu0 %2122 }
 0x617   : > { %v2127_v18 = vpop.permute.xlu0 %2126 }
 0x61b   : > { %v2131_v21 = vpop.permute.xlu0 %2130 }
 0x61f   : > { %v2135_v29 = vpop.permute.xlu0 %2134 }
 0x67b   : > { %v3312_v50 = vpop.f32.mrf.mxu1 }
 0x67d   : > { %v1249_v51 = vpop.f32.mrf.mxu1 }
 0x67e   : > { %3324 = vmatprep.mubr.msk.f32.mxu1 %vm471_vm1, %v1249_v51 }
 0x67f   : > { %3325 = vmatmul.mubr.msk.f32.vlgmr.msra.gmra.mxu1 %vm471_vm1, %v3312_v50  ;;  %v2912_v50 = vld [vmem:[%s4754_s5 + $0x98] sm:$0xff] }
 0x680   : > { %3351 = vmatpush3.xpose.msk.msra.mxu1 %vm471_vm1, %v1587_v42  ;;  %v2909_v42 = vld [vmem:[%s4754_s5 + $0x80] sm:$0xff] }
 0x681   : > { %3352 = vmatprep.subr.msk.mxu1 %vm471_vm1, %v1585_v49 }
 0x684   : > { %3353 = vmatpush3.xpose.msk.msra.mxu1 %vm471_vm1, %v1585_v49 }
 0x685   : > { %3354 = vmatprep.subr.msk.mxu1 %vm471_vm1, %v1583_v52 }
 0x688   : > { %3355 = vmatpush3.xpose.msk.msra.mxu1 %vm471_vm1, %v1583_v52 }
 0x689   : > { %3356 = vmatprep.subr.msk.mxu1 %vm471_vm1, %v1581_v54 }
 0x68c   : > { %3357 = vmatpush3.xpose.msk.msra.mxu1 %vm471_vm1, %v1581_v54  ;;  %v2913_v54 = vld [vmem:[%s4754_s5 + $0xa0] sm:$0xff] }
 0x68d   : > { %3358 = vmatprep.subr.msk.mxu1 %vm471_vm1, %v1579_v56 }
 0x690   : > { %3359 = vmatpush3.xpose.msk.msra.mxu1 %vm471_vm1, %v1579_v56 }
 0x691   : > { %3360 = vmatprep.subr.msk.mxu1 %vm471_vm1, %v1577_v58 }
 0x694   : > { %3361 = vmatpush3.xpose.msk.msra.mxu1 %vm471_vm1, %v1577_v58 }
 0x695   : > { %3362 = vmatprep.subr.msk.mxu1 %vm471_vm1, %v1575_v53 }
 0x698   : > { %3363 = vmatpush3.xpose.msk.msra.mxu1 %vm471_vm1, %v1575_v53 }
 0x699   : > { %3364 = vmatprep.subr.msk.mxu1 %vm471_vm1, %v1573_v61 }
 0x69c   : > { %3365 = vmatpush3.xpose.msk.msra.mxu1 %vm471_vm1, %v1573_v61 }
 0x69d   : > { %3420 = vmatprep.subr.msk.mxu1 %vm471_vm1, %v2153_v62 }
 0x6ac   : > { %v3315_v0 = vpop.f32.mrf.mxu1 }
 0x6ae   : > { %v1259_v1 = vpop.f32.mrf.mxu1 }
 0x6af   : > { %3327 = vmatprep.mubr.msk.f32.mxu1 %vm471_vm1, %v1259_v1 }
 0x6b0   : > { %3328 = vmatmul.mubr.msk.f32.gmra.mxu1 %vm471_vm1, %v3315_v0 }
 0x6b1   : > { %v3318_v3 = vpop.f32.mrf.mxu1 }
 0x6b3   : > { %v1269_v4 = vpop.f32.mrf.mxu1 }
 0x6b4   : > { %3330 = vmatprep.mubr.msk.f32.mxu1 %vm471_vm1, %v1269_v4 }
 0x6b5   : > { %3331 = vmatmul.mubr.msk.f32.gmra.mxu1 %vm471_vm1, %v3318_v3 }
 0x6b8   : > { %v3321_v6 = vpop.f32.mrf.mxu1 }
 0x6ba   : > { %v1279_v8 = vpop.f32.mrf.mxu1 }
 0x6bb   : > { %3333 = vmatprep.mubr.msk.f32.mxu1 %vm471_vm1, %v1279_v8 }
 0x6bc   : > { %3334 = vmatmul.mubr.msk.f32.gmra.mxu1 %vm471_vm1, %v3321_v6 }
 0x6bd   : > { %3366 = vmatprep.mubr.msk.f32.mxu1 %vm471_vm1, %v1557_v55 }
 0x6c0   : > { %3367 = vmatmul.mubr.msk.f32.vlgmr.msra.gmra.mxu1 %vm471_vm1, %v1559_v63  ;;  %v2916_v63 = vld [vmem:[%s4754_s5 + $0xb8] sm:$0xff] }
 0x6c1   : > { %3421 = vmatpush3.xpose.msk.msra.mxu1 %vm471_vm1, %v2153_v62  ;;  %3369 = vmatprep.mubr.msk.f32.mxu1 %vm471_vm1, %v1561_v57  ;;  %v2914_v57 = vld [vmem:[%s4754_s5 + $0xa8] sm:$0xff] }
 0x6c2   : > { %3422 = vmatprep.subr.msk.mxu1 %vm471_vm1, %v2151_v10 }
 0x6c4   : > { %3370 = vmatmul.mubr.msk.f32.gmra.mxu1 %vm471_vm1, %v1563_v2 }
 0x6c5   : > { %3423 = vmatpush3.xpose.msk.msra.mxu1 %vm471_vm1, %v2151_v10  ;;  %3372 = vmatprep.mubr.msk.f32.mxu1 %vm471_vm1, %v1565_v59 }
 0x6c6   : > { %3424 = vmatprep.subr.msk.mxu1 %vm471_vm1, %v2149_v7 }
 0x6c8   : > { %3373 = vmatmul.mubr.msk.f32.gmra.mxu1 %vm471_vm1, %v1567_v5  ;;  %v2915_v5 = vld [vmem:[%s4754_s5 + $0xb0] sm:$0xff] }
 0x6c9   : > { %3425 = vmatpush3.xpose.msk.msra.mxu1 %vm471_vm1, %v2149_v7  ;;  %3375 = vmatprep.mubr.msk.f32.mxu1 %vm471_vm1, %v1569_v60 }
 0x6ca   : > { %3426 = vmatprep.subr.msk.mxu1 %vm471_vm1, %v2147_v12 }
 0x6cc   : > { %3376 = vmatmul.mubr.msk.f32.gmra.mxu1 %vm471_vm1, %v1571_v9 }
 0x6cd   : > { %3427 = vmatpush3.xpose.msk.msra.mxu1 %vm471_vm1, %v2147_v12  ;;  %3436 = vmatprep.mubr.msk.f32.mxu1 %vm471_vm1, %v2123_v13 }
 0x6ce   : > { %3428 = vmatprep.subr.msk.mxu1 %vm471_vm1, %v2145_v41 }
 0x6d1   : > { %3429 = vmatpush3.xpose.msk.msra.mxu1 %vm471_vm1, %v2145_v41 }
 0x6d2   : > { %3430 = vmatprep.subr.msk.mxu1 %vm471_vm1, %v2143_v14 }
 0x6d5   : > { %3431 = vmatpush3.xpose.msk.msra.mxu1 %vm471_vm1, %v2143_v14 }
 0x6d6   : > { %3432 = vmatprep.subr.msk.mxu1 %vm471_vm1, %v2141_v11 }
 0x6d9   : > { %3433 = vmatpush3.xpose.msk.msra.mxu1 %vm471_vm1, %v2141_v11 }
 0x6da   : > { %3434 = vmatprep.subr.msk.mxu1 %vm471_vm1, %v2139_v16 }
 0x6dd   : > { %3435 = vmatpush3.xpose.msk.msra.mxu1 %vm471_vm1, %v2139_v16 }
 0x6e0   : > { %3437 = vmatmul.mubr.msk.f32.vlgmr.msra.gmra.mxu1 %vm471_vm1, %v2125_v17 }
 0x6e1   : > { %3439 = vmatprep.mubr.msk.f32.mxu1 %vm471_vm1, %v2127_v18 }
 0x6e4   : > { %3440 = vmatmul.mubr.msk.f32.gmra.mxu1 %vm471_vm1, %v2129_v20 }
 0x6e5   : > { %3442 = vmatprep.mubr.msk.f32.mxu1 %vm471_vm1, %v2131_v21 }
 0x6e8   : > { %3443 = vmatmul.mubr.msk.f32.gmra.mxu1 %vm471_vm1, %v2133_v24 }
 0x6e9   : > { %3445 = vmatprep.mubr.msk.f32.mxu1 %vm471_vm1, %v2135_v29 }
 0x6ec   : > { %3446 = vmatmul.mubr.msk.f32.gmra.mxu1 %vm471_vm1, %v2137_v30 }
 0x73f   : > { %v4333_v31 = vpop.f32.mrf.mxu1 }
 0x741   : > { %v4335_v32 = vpop.f32.mrf.mxu1 }
 0x770   : > { %v4337_v33 = vpop.f32.mrf.mxu1 }
 0x772   : > { %v4339_v34 = vpop.f32.mrf.mxu1 }
 0x775   : > { %v4341_v35 = vpop.f32.mrf.mxu1 }
 0x777   : > { %v4343_v36 = vpop.f32.mrf.mxu1 }
 0x77c   : > { %v4345_v37 = vpop.f32.mrf.mxu1 }
 0x77e   : > { %v4347_v38 = vpop.f32.mrf.mxu1 }
 0x780   : > { %v3368_v40 = vpop.f32.mrf.mxu1 }
 0x781   : > { %v1692_v43 = vadd.f32 %v3368_v40, %v2910_v39 }
 0x782   : > { %v1686_v44 = vpop.f32.mrf.mxu1 }
 0x783   : > { %v1687_v45 = vadd.f32 %v2909_v42, %v1686_v44  ;;  %v1728_v46 = vsel %vm609_vm2, %v1692_v43, -inf }
 0x784   : > { %1729 = vmax.xlane.f32.xlu1 %v1728_v46  ;;  %v3371_v47 = vpop.f32.mrf.mxu1 }
 0x785   : > { %v1725_v49 = vsel %vm609_vm2, %v1687_v45, -inf  ;;  %v1702_v55 = vadd.f32 %v3371_v47, %v2912_v50 }
 0x786   : > { %1726 = vmax.xlane.f32.xlu0 %v1725_v49  ;;  %v1696_v51 = vpop.f32.mrf.mxu1 }
 0x787   : > { %v1697_v52 = vadd.f32 %v2911_v48, %v1696_v51  ;;  %v1734_v61 = vsel %vm609_vm2, %v1702_v55, -inf }
 0x788   : > { %v3374_v53 = vpop.f32.mrf.mxu1 }
 0x789   : > { %v1731_v56 = vsel %vm609_vm2, %v1697_v52, -inf  ;;  %v1712_v60 = vadd.f32 %v3374_v53, %v2914_v57 }
 0x78a   : > { %1732 = vmax.xlane.f32.xlu0 %v1731_v56  ;;  %v1706_v58 = vpop.f32.mrf.mxu1 }
 0x78b   : > { %v1707_v59 = vadd.f32 %v2913_v54, %v1706_v58  ;;  %v1740_v2 = vsel %vm609_vm2, %v1712_v60, -inf }
 0x78c   : > { %v3377_v0 = vpop.f32.mrf.mxu1 }
 0x78d   : > { %v1737_v62 = vsel %vm609_vm2, %v1707_v59, -inf  ;;  %v1722_v1 = vadd.f32 %v3377_v0, %v2916_v63 }
 0x78e   : > { %1735 = vmax.xlane.f32.xlu0 %v1734_v61  ;;  %1738 = vmax.xlane.f32.xlu1 %v1737_v62  ;;  %v1716_v4 = vpop.f32.mrf.mxu1 }
 0x78f   : > { %v1746_v3 = vsel %vm609_vm2, %v1722_v1, -inf  ;;  %v4388_v6 = vadd.f32 %v2915_v5, %v1716_v4 }
 0x791   : > { %v1743_v7 = vsel %vm609_vm2, %v4388_v6, -inf }
 0x792   : > { %1741 = vmax.xlane.f32.xlu0 %v1740_v2 }
 0x796   : > { %1747 = vmax.xlane.f32.xlu0 %v1746_v3 }
 0x79f   : > { %1836 = vrot.lane.b32.xlu1 %v3890_v23, %s3757_s19 }
 0x7a0   : > { %v3438_v4 = vpop.f32.mrf.mxu1 }
 0x7a2   : > { %v2252_v5 = vpop.f32.mrf.mxu1 }
 0x7a3   : > { %1832 = vrot.lane.b32.xlu1 %v3885_v19, %s3757_s19 }
 0x7ac   : > { %1834 = vrot.lane.b32.xlu0 %v3896_v26, %s3757_s19 }
 0x7b0   : > { %1828 = vrot.lane.b32.xlu0 %v3900_v27, %s3757_s19 }
 0x7c7   : > { %1744 = vmax.xlane.f32.xlu1 %v1743_v7  ;;  %v2957_v7 = vld [vmem:[%s4754_s5 + $0xc0] sm:$0xff] }
 0x7d8   : > { %1830 = vrot.lane.b32.xlu1 %v3888_v22, %s3757_s19 }
 0x7dc   : > { %1826 = vrot.lane.b32.xlu1 %v3894_v25, %s3757_s19 }
 0x80d   : > { %v1730_v8 = vpop.xlane.xlu1 %1729 }
 0x80e   : > { %v1750_v9 = vsub.f32 %v1692_v43, %v1730_v8  ;;  %v3441_v8 = vpop.f32.mrf.mxu1 }
 0x80f   : > { %v1727_v41 = vpop.xlane.xlu0 %1726 }
 0x810   : > { %v1759_v10 = vmul.f32 1.442695, %v1750_v9  ;;  %v1749_v11 = vsub.f32 %v1687_v45, %v1727_v41  ;;  %v4434_v41 = vadd.f32 %v2957_v7, %v2252_v5 }
 0x812   : > { %3622 = vpow2.f32 %v1759_v10  ;;  %v1757_v12 = vmul.f32 1.442695, %v1749_v11  ;;  %v2262_v10 = vpop.f32.mrf.mxu1  ;;  %v2959_v11 = vld [vmem:[%s4754_s5 + $0xd0] sm:$0xff] }
 0x813   : > { %v1733_v13 = vpop.xlane.xlu0 %1732 }
 0x814   : > { %3624 = vpow2.f32 %v1757_v12  ;;  %v1751_v14 = vsub.f32 %v1697_v52, %v1733_v13  ;;  %v4439_v12 = vadd.f32 %v2959_v11, %v2262_v10  ;;  %v2291_v13 = vsel %vm609_vm2, %v4434_v41, -inf }
 0x816   : > { %v1761_v16 = vmul.f32 1.442695, %v1751_v14  ;;  %v2960_v14 = vld [vmem:[%s4754_s5 + $0xd8] sm:$0xff] }
 0x817   : > { %v1739_v17 = vpop.xlane.xlu1 %1738  ;;  %v1736_v18 = vpop.xlane.xlu0 %1735 }
 0x818   : > { %3626 = vpow2.f32 %v1761_v16  ;;  %v1753_v20 = vsub.f32 %v1707_v59, %v1739_v17  ;;  %v1752_v21 = vsub.f32 %v1702_v55, %v1736_v18  ;;  %v3444_v16 = vpop.f32.mrf.mxu1  ;;  %v4446_v17 = vadd.f32 %v3441_v8, %v2960_v14 }
 0x819   : > { %v2297_v18 = vsel %vm609_vm2, %v4439_v12, -inf }
 0x81a   : > { %v1765_v24 = vmul.f32 1.442695, %v1753_v20  ;;  %v1763_v29 = vmul.f32 1.442695, %v1752_v21  ;;  %v2962_v20 = vld [vmem:[%s4754_s5 + $0xe8] sm:$0xff]  ;;  %v2272_v21 = vpop.f32.mrf.mxu1 }
 0x81b   : > { %v1837_v30 = vpop.permute.xlu1 %1836  ;;  %v1742_v39 = vpop.xlane.xlu0 %1741 }
 0x81c   : > { %3628 = vpow2.f32 %v1765_v24  ;;  %v1754_v40 = vsub.f32 %v1712_v60, %v1742_v39  ;;  %3378 = vmatprep.subr.mxu0 %v1837_v30  ;;  %v4453_v24 = vadd.f32 %v3444_v16, %v2962_v20  ;;  %v3447_v39 = vpop.f32.mrf.mxu1 }
 0x81d   : > { %3630 = vpow2.f32 %v1763_v29  ;;  %3379 = vmatpush3.msra.mxu0 %v1837_v30  ;;  %v2300_v29 = vsel %vm609_vm2, %v4446_v17, -inf  ;;  %v2964_v30 = vld [vmem:[%s4754_s5 + $0xf8] sm:$0xff] }
 0x81e   : > { %v1767_v42 = vmul.f32 1.442695, %v1754_v40  ;;  %v4460_v40 = vadd.f32 %v3447_v39, %v2964_v30 }
 0x81f   : > { %v4396_v43 = vpop.eup %3622  ;;  %v1748_v44 = vpop.xlane.xlu0 %1747 }
 0x820   : > { %3632 = vpow2.f32 %v1767_v42  ;;  %v1756_v45 = vsub.f32 %v1722_v1, %v1748_v44  ;;  %v1776_v46 = vsel %vm609_vm2, %v4396_v43, 0.0  ;;  %v1833_v52 = vpop.permute.xlu1 %1832  ;;  %v2306_v42 = vsel %vm609_vm2, %v4453_v24, -inf }
 0x821   : > { %v4400_v47 = vpop.eup %3624  ;;  %1777 = vadd.xlane.f32.xlu0 %v1776_v46  ;;  %v2312_v44 = vsel %vm609_vm2, %v4460_v40, -inf }
 0x822   : > { %v1771_v48 = vmul.f32 1.442695, %v1756_v45  ;;  %v1773_v49 = vsel %vm609_vm2, %v4400_v47, 0.0  ;;  %v2958_v45 = vld [vmem:[%s4754_s5 + $0xc8] sm:$0xff] }
 0x823   : > { %1774 = vadd.xlane.f32.xlu1 %v1773_v49  ;;  %v1835_v50 = vpop.permute.xlu0 %1834  ;;  %v4475_v46 = vadd.f32 %v3438_v4, %v2958_v45 }
 0x824   : > { %3634 = vpow2.f32 %v1771_v48  ;;  %3380 = vmatprep.subr.mxu0 %v1835_v50  ;;  %v2961_v48 = vld [vmem:[%s4754_s5 + $0xe0] sm:$0xff] }
 0x825   : > { %v4404_v51 = vpop.eup %3626  ;;  %3381 = vmatpush3.msra.mxu0 %v1835_v50  ;;  %v4480_v49 = vadd.f32 %v2961_v48, %v2272_v21  ;;  %v2294_v50 = vsel %vm609_vm2, %v4475_v46, -inf }
 0x826   : > { %3382 = vmatprep.subr.mxu0 %v1833_v52  ;;  %v1779_v53 = vsel %vm609_vm2, %v4404_v51, 0.0 }
 0x827   : > { %1780 = vadd.xlane.f32.xlu1 %v1779_v53  ;;  %3383 = vmatpush3.msra.mxu0 %v1833_v52  ;;  %v1829_v2 = vpop.permute.xlu0 %1828  ;;  %v2282_v52 = vpop.f32.mrf.mxu1 }
 0x829   : > { %v4408_v54 = vpop.eup %3628 }
 0x82a   : > { %v4410_v55 = vpop.eup %3630  ;;  %v1785_v56 = vsel %vm609_vm2, %v4408_v54, 0.0 }
 0x82b   : > { %1786 = vadd.xlane.f32.xlu1 %v1785_v56  ;;  %v1782_v57 = vsel %vm609_vm2, %v4410_v55, 0.0 }
 0x82c   : > { %1783 = vadd.xlane.f32.xlu0 %v1782_v57 }
 0x82d   : > { %v4416_v58 = vpop.eup %3632 }
 0x82e   : > { %v1788_v59 = vsel %vm609_vm2, %v4416_v58, 0.0 }
 0x830   : > { %1789 = vadd.xlane.f32.xlu0 %v1788_v59 }
 0x831   : > { %v4420_v60 = vpop.eup %3634 }
 0x832   : > { %v1794_v61 = vsel %vm609_vm2, %v4420_v60, 0.0 }
 0x834   : > { %1795 = vadd.xlane.f32.xlu0 %v1794_v61 }
 0x84a   : > { %1824 = vrot.lane.b32.xlu0 %v3904_v28, %s3757_s19 }
 0x850   : > { %v1745_v62 = vpop.xlane.xlu1 %1744 }
 0x851   : > { %v1755_v63 = vsub.f32 %v4388_v6, %v1745_v62 }
 0x853   : > { %v1769_v0 = vmul.f32 1.442695, %v1755_v63 }
 0x854   : > { %v1831_v1 = vpop.permute.xlu1 %1830 }
 0x855   : > { %3636 = vpow2.f32 %v1769_v0  ;;  %3384 = vmatprep.subr.mxu0 %v1831_v1 }
 0x856   : > { %3385 = vmatpush3.msra.mxu0 %v1831_v1 }
 0x857   : > { %3386 = vmatprep.subr.mxu0 %v1829_v2 }
 0x858   : > { %v1827_v3 = vpop.permute.xlu1 %1826  ;;  %3387 = vmatpush3.msra.mxu0 %v1829_v2 }
 0x859   : > { %3388 = vmatprep.subr.mxu0 %v1827_v3 }
 0x85a   : > { %3389 = vmatpush3.msra.mxu0 %v1827_v3 }
 0x862   : > { %v4430_v9 = vpop.eup %3636 }
 0x863   : > { %v1791_v6 = vsel %vm609_vm2, %v4430_v9, 0.0 }
 0x864   : > { %1792 = vadd.xlane.f32.xlu1 %v1791_v6 }
 0x869   : > { %2292 = vmax.xlane.f32.xlu0 %v2291_v13 }
 0x86d   : > { %2298 = vmax.xlane.f32.xlu0 %v2297_v18 }
 0x871   : > { %2301 = vmax.xlane.f32.xlu0 %v2300_v29 }
 0x875   : > { %2307 = vmax.xlane.f32.xlu0 %v2306_v42  ;;  %1822 = vrot.lane.b32.xlu1 %v3881_v15, %s3757_s19 }
 0x879   : > { %2313 = vmax.xlane.f32.xlu0 %v2312_v44 }
 0x88f   : > { %2400 = vrot.lane.b32.xlu0 %v3896_v26, %s3758_s13  ;;  %v2963_v26 = vld [vmem:[%s4754_s5 + $0xf0] sm:$0xff] }
 0x890   : > { %v4487_v53 = vadd.f32 %v2963_v26, %v2282_v52 }
 0x892   : > { %v2309_v56 = vsel %vm609_vm2, %v4487_v53, -inf }
 0x893   : > { %2394 = vrot.lane.b32.xlu0 %v3900_v27, %s3758_s13  ;;  %v2303_v27 = vsel %vm609_vm2, %v4480_v49, -inf }
 0x899   : > { %2295 = vmax.xlane.f32.xlu1 %v2294_v50 }
 0x89d   : > { %2304 = vmax.xlane.f32.xlu1 %v2303_v27 }
 0x8a1   : > { %2310 = vmax.xlane.f32.xlu1 %v2309_v56 }
 0x8aa   : > { %v1778_v57 = vpop.xlane.xlu0 %1777 }
 0x8ab   : > { %3638 = vrcp.f32 %v1778_v57 }
 0x8ac   : > { %v1775_v59 = vpop.xlane.xlu1 %1774 }
 0x8ad   : > { %3640 = vrcp.f32 %v1775_v59 }
 0x8b0   : > { %v1781_v61 = vpop.xlane.xlu1 %1780 }
 0x8b1   : > { %3642 = vrcp.f32 %v1781_v61 }
 0x8b2   : > { %2402 = vrot.lane.b32.xlu1 %v3890_v23, %s3758_s13 }
 0x8b4   : > { %v1787_v62 = vpop.xlane.xlu1 %1786 }
 0x8b5   : > { %3644 = vrcp.f32 %v1787_v62  ;;  %v1784_v63 = vpop.xlane.xlu0 %1783 }
 0x8b6   : > { %3646 = vrcp.f32 %v1784_v63  ;;  %2398 = vrot.lane.b32.xlu1 %v3885_v19, %s3758_s13 }
 0x8b8   : > { %v3639_v0 = vpop.eup %3638 }
 0x8b9   : > { %v1806_v1 = vmul.f32 %v3639_v0, %v4396_v43  ;;  %v1790_v2 = vpop.xlane.xlu0 %1789 }
 0x8ba   : > { %v3641_v3 = vpop.eup %3640  ;;  %3648 = vrcp.f32 %v1790_v2  ;;  %2396 = vrot.lane.b32.xlu1 %v3888_v22, %s3758_s13 }
 0x8bb   : > { %2934 = vst.msk [vmem:[%s4049_s9 + $0x88] sm:$0xff] %vm609_vm2, %v1806_v1  ;;  %v1805_v23 = vmul.f32 %v3641_v3, %v4400_v47 }
 0x8bd   : > { %v1796_v4 = vpop.xlane.xlu0 %1795  ;;  %2933 = vst.msk [vmem:[%s4049_s9 + $0x80] sm:$0xff] %vm609_vm2, %v1805_v23  ;;  %3394 = vmatprep.mubr.msk.f32.mxu0 %vm609_vm2, %v1805_v23 }
 0x8be   : > { %v3643_v19 = vpop.eup %3642  ;;  %3650 = vrcp.f32 %v1796_v4  ;;  %2392 = vrot.lane.b32.xlu1 %v3894_v25, %s3758_s13 }
 0x8bf   : > { %v1807_v43 = vmul.f32 %v3643_v19, %v4404_v51 }
 0x8c1   : > { %v1825_v22 = vpop.permute.xlu0 %1824  ;;  %2935 = vst.msk [vmem:[%s4049_s9 + $0x90] sm:$0xff] %vm609_vm2, %v1807_v43 }
 0x8c2   : > { %v3645_v47 = vpop.eup %3644  ;;  %3390 = vmatprep.subr.mxu0 %v1825_v22 }
 0x8c3   : > { %v3647_v5 = vpop.eup %3646  ;;  %3391 = vmatpush3.msra.mxu0 %v1825_v22  ;;  %v1809_v7 = vmul.f32 %v3645_v47, %v4408_v54  ;;  %v1975_v54 = vld [vmem:[%s4752_s3 + $0x10] sm:$0xff] }
 0x8c4   : > { %v1808_v8 = vmul.f32 %v3647_v5, %v4410_v55 }
 0x8c5   : > { %2937 = vst.msk [vmem:[%s4049_s9 + $0xa0] sm:$0xff] %vm609_vm2, %v1809_v7 }
 0x8c6   : > { %2936 = vst.msk [vmem:[%s4049_s9 + $0x98] sm:$0xff] %vm609_vm2, %v1808_v8 }
 0x8c7   : > { %v3649_v6 = vpop.eup %3648 }
 0x8c8   : > { %v1810_v25 = vmul.f32 %v3649_v6, %v4416_v58 }
 0x8ca   : > { %2938 = vst.msk [vmem:[%s4049_s9 + $0xa8] sm:$0xff] %vm609_vm2, %v1810_v25 }
 0x8cb   : > { %v3651_v51 = vpop.eup %3650 }
 0x8cc   : > { %v1812_v10 = vmul.f32 %v3651_v51, %v4420_v60 }
 0x8ce   : > { %2940 = vst.msk [vmem:[%s4049_s9 + $0xb8] sm:$0xff] %vm609_vm2, %v1812_v10 }
 0x8ed   : > { %v1793_v11 = vpop.xlane.xlu1 %1792 }
 0x8ee   : > { %3652 = vrcp.f32 %v1793_v11 }
 0x8f1   : > { %v1823_v13 = vpop.permute.xlu1 %1822 }
 0x8f2   : > { %v2293_v55 = vpop.xlane.xlu0 %2292  ;;  %3392 = vmatprep.subr.mxu0 %v1823_v13 }
 0x8f3   : > { %v2315_v14 = vsub.f32 %v4434_v41, %v2293_v55  ;;  %3393 = vmatpush3.msra.mxu0 %v1823_v13 }
 0x8f4   : > { %3395 = vmatmul.mubr.msk.f32.vlgmr.msra.gmra.mxu0 %vm609_vm2, %v1806_v1  ;;  %3406 = vmatprep.subr.mxu0 %v1975_v54 }
 0x8f5   : > { %v2323_v58 = vmul.f32 1.442695, %v2315_v14  ;;  %3397 = vmatprep.mubr.msk.f32.mxu0 %vm609_vm2, %v1807_v43  ;;  %3407 = vmatpush3.msra.mxu0 %v1975_v54 }
 0x8f6   : > { %v2299_v60 = vpop.xlane.xlu0 %2298 }
 0x8f7   : > { %3654 = vpow2.f32 %v2323_v58  ;;  %v2317_v16 = vsub.f32 %v4439_v12, %v2299_v60 }
 0x8f8   : > { %3398 = vmatmul.mubr.msk.f32.gmra.mxu0 %vm609_vm2, %v1808_v8 }
 0x8f9   : > { %v2327_v18 = vmul.f32 1.442695, %v2317_v16  ;;  %3400 = vmatprep.mubr.msk.f32.mxu0 %vm609_vm2, %v1809_v7 }
 0x8fa   : > { %v2302_v39 = vpop.xlane.xlu0 %2301 }
 0x8fb   : > { %v3653_v20 = vpop.eup %3652  ;;  %3656 = vpow2.f32 %v2327_v18  ;;  %v2318_v42 = vsub.f32 %v4446_v17, %v2302_v39 }
 0x8fc   : > { %3401 = vmatmul.mubr.msk.f32.gmra.mxu0 %vm609_vm2, %v1810_v25  ;;  %v1811_v41 = vmul.f32 %v3653_v20, %v4430_v9 }
 0x8fd   : > { %v2329_v48 = vmul.f32 1.442695, %v2318_v42 }
 0x8fe   : > { %2939 = vst.msk [vmem:[%s4049_s9 + $0xb0] sm:$0xff] %vm609_vm2, %v1811_v41  ;;  %3403 = vmatprep.mubr.msk.f32.mxu0 %vm609_vm2, %v1811_v41  ;;  %v2308_v9 = vpop.xlane.xlu0 %2307 }
 0x8ff   : > { %v2320_v50 = vsub.f32 %v4453_v24, %v2308_v9 }
 0x900   : > { %3404 = vmatmul.mubr.msk.f32.gmra.mxu0 %vm609_vm2, %v1812_v10  ;;  %v4593_v10 = vpop.f32.mrf.mxu0 }
 0x901   : > { %v2333_v57 = vmul.f32 1.442695, %v2320_v50 }
 0x902   : > { %v2314_v26 = vpop.xlane.xlu0 %2313  ;;  %v4595_v11 = vpop.f32.mrf.mxu0 }
 0x903   : > { %v2322_v59 = vsub.f32 %v4460_v40, %v2314_v26 }
 0x904   : > { %v4538_v21 = vpop.eup %3654  ;;  %v4597_v54 = vpop.f32.mrf.mxu0 }
 0x905   : > { %v2339_v12 = vsel %vm609_vm2, %v4538_v21, 0.0 }
 0x906   : > { %2340 = vadd.xlane.f32.xlu1 %v2339_v12  ;;  %v2401_v24 = vpop.permute.xlu0 %2400 }
 0x908   : > { %v4542_v29 = vpop.eup %3656 }
 0x909   : > { %v2345_v30 = vsel %vm609_vm2, %v4542_v29, 0.0 }
 0x90a   : > { %2346 = vadd.xlane.f32.xlu1 %v2345_v30  ;;  %v4569_v23 = vpop.permute.xlu0 %2394 }
 0x922   : > { %v2296_v44 = vpop.xlane.xlu1 %2295 }
 0x923   : > { %v2316_v45 = vsub.f32 %v4475_v46, %v2296_v44  ;;  %v2337_v46 = vmul.f32 1.442695, %v2322_v59 }
 0x925   : > { %v2325_v52 = vmul.f32 1.442695, %v2316_v45 }
 0x926   : > { %v2305_v27 = vpop.xlane.xlu1 %2304 }
 0x927   : > { %3658 = vpow2.f32 %v2325_v52  ;;  %v2319_v56 = vsub.f32 %v4480_v49, %v2305_v27 }
 0x928   : > { %3660 = vpow2.f32 %v2329_v48 }
 0x929   : > { %v2331_v61 = vmul.f32 1.442695, %v2319_v56 }
 0x92a   : > { %v2311_v62 = vpop.xlane.xlu1 %2310 }
 0x92b   : > { %3662 = vpow2.f32 %v2331_v61  ;;  %v2321_v17 = vsub.f32 %v4487_v53, %v2311_v62 }
 0x92c   : > { %3664 = vpow2.f32 %v2333_v57 }
 0x92d   : > { %v2335_v63 = vmul.f32 1.442695, %v2321_v17 }
 0x92e   : > { %v4552_v0 = vpop.permute.xlu1 %2402 }
 0x92f   : > { %3666 = vpow2.f32 %v2335_v63  ;;  %3448 = vmatprep.subr.mxu0 %v4552_v0  ;;  %3490 = vmatprep.subr.mxu1 %v4552_v0 }
 0x930   : > { %3498 = vmatpush3.msra.mxu1 %v4552_v0  ;;  %3668 = vpow2.f32 %v2337_v46 }
 0x931   : > { %3491 = vmatprep.subr.mxu1 %v2401_v24 }
 0x932   : > { %v4557_v40 = vpop.permute.xlu1 %2398  ;;  %3499 = vmatpush3.msra.mxu1 %v2401_v24 }
 0x933   : > { %3492 = vmatprep.subr.mxu1 %v4557_v40 }
 0x934   : > { %v4560_v49 = vpop.eup %3658  ;;  %3500 = vmatpush3.msra.mxu1 %v4557_v40 }
 0x935   : > { %v2342_v53 = vsel %vm609_vm2, %v4560_v49, 0.0  ;;  %v4565_v1 = vpop.eup %3660 }
 0x936   : > { %v2397_v2 = vpop.permute.xlu1 %2396  ;;  %2343 = vadd.xlane.f32.xlu0 %v2342_v53  ;;  %v2348_v19 = vsel %vm609_vm2, %v4565_v1, 0.0  ;;  %v2541_v53 = vld [vmem:[%s4752_s3 + $0x18] sm:$0xff] }
 0x937   : > { %3493 = vmatprep.subr.mxu1 %v2397_v2 }
 0x938   : > { %v4567_v3 = vpop.eup %3662  ;;  %3501 = vmatpush3.msra.mxu1 %v2397_v2 }
 0x939   : > { %3494 = vmatprep.subr.mxu1 %v4569_v23  ;;  %v2351_v4 = vsel %vm609_vm2, %v4567_v3, 0.0  ;;  %v4576_v43 = vpop.eup %3664 }
 0x93a   : > { %v2393_v22 = vpop.permute.xlu1 %2392  ;;  %2352 = vadd.xlane.f32.xlu1 %v2351_v4  ;;  %2349 = vadd.xlane.f32.xlu0 %v2348_v19  ;;  %v2354_v7 = vsel %vm609_vm2, %v4576_v43, 0.0  ;;  %v1524_v19 = vadd.f32 %v4597_v54, %v4337_v33 }
 0x93b   : > { %3502 = vmatpush3.msra.mxu1 %v4569_v23 }
 0x93c   : > { %v4579_v47 = vpop.eup %3666  ;;  %3495 = vmatprep.subr.mxu1 %v2393_v22 }
 0x93d   : > { %3503 = vmatpush3.msra.mxu1 %v2393_v22  ;;  %v2357_v5 = vsel %vm609_vm2, %v4579_v47, 0.0  ;;  %v4585_v8 = vpop.eup %3668 }
 0x93e   : > { %2358 = vadd.xlane.f32.xlu1 %v2357_v5  ;;  %2355 = vadd.xlane.f32.xlu0 %v2354_v7  ;;  %v2360_v6 = vsel %vm609_vm2, %v4585_v8, 0.0 }
 0x942   : > { %2361 = vadd.xlane.f32.xlu0 %v2360_v6 }
 0x94f   : > { %2388 = vrot.lane.b32.xlu1 %v3881_v15, %s3758_s13  ;;  %v4602_v15 = vpop.f32.mrf.mxu0 }
 0x951   : > { %v4610_v58 = vpop.f32.mrf.mxu0 }
 0x953   : > { %v4612_v60 = vpop.f32.mrf.mxu0 }
 0x955   : > { %v4614_v16 = vpop.f32.mrf.mxu0 }
 0x956   : > { %v1544_v33 = vadd.f32 %v4614_v16, %v4345_v37  ;;  %v3005_v16 = vld [vmem:[%s4753_s4] ss:$0 sm:$0xff] }
 0x957   : > { %v4616_v18 = vpop.f32.mrf.mxu0 }
 0x958   : > { %2390 = vrot.lane.b32.xlu0 %v3904_v28, %s3758_s13 }
 0x98f   : > { %v2341_v25 = vpop.xlane.xlu1 %2340 }
 0x990   : > { %3670 = vrcp.f32 %v2341_v25 }
 0x993   : > { %v2347_v51 = vpop.xlane.xlu1 %2346 }
 0x994   : > { %3672 = vrcp.f32 %v2347_v51 }
 0x99d   : > { %v3671_v13 = vpop.eup %3670 }
 0x99e   : > { %v2371_v55 = vmul.f32 %v3671_v13, %v4538_v21 }
 0x9a0   : > { %2981 = vst.msk [vmem:[%s4049_s9 + $0xc0] sm:$0xff] %vm609_vm2, %v2371_v55 }
 0x9a1   : > { %v3673_v14 = vpop.eup %3672 }
 0x9a2   : > { %v4605_v28 = vmul.f32 %v3673_v14, %v4542_v29 }
 0x9a4   : > { %2983 = vst.msk [vmem:[%s4049_s9 + $0xd0] sm:$0xff] %vm609_vm2, %v4605_v28 }
 0x9b4   : > { %v3396_v20 = vpop.f32.mrf.mxu0 }
 0x9b6   : > { %v1936_v41 = vpop.f32.mrf.mxu0 }
 0x9b7   : > { %3408 = vmatprep.mubr.msk.f32.mxu0 %vm471_vm1, %v1936_v41 }
 0x9b8   : > { %v3399_v21 = vpop.f32.mrf.mxu0  ;;  %3409 = vmatmul.mubr.msk.f32.vlgmr.msra.gmra.mxu0 %vm471_vm1, %v3396_v20 }
 0x9b9   : > { %3449 = vmatpush3.msra.mxu0 %v4552_v0 }
 0x9ba   : > { %3450 = vmatprep.subr.mxu0 %v2401_v24  ;;  %v1946_v12 = vpop.f32.mrf.mxu0 }
 0x9bb   : > { %3451 = vmatpush3.msra.mxu0 %v2401_v24  ;;  %3411 = vmatprep.mubr.msk.f32.mxu0 %vm471_vm1, %v1946_v12 }
 0x9bc   : > { %3452 = vmatprep.subr.mxu0 %v4557_v40  ;;  %v3402_v29 = vpop.f32.mrf.mxu0  ;;  %3412 = vmatmul.mubr.msk.f32.gmra.mxu0 %vm471_vm1, %v3399_v21 }
 0x9bd   : > { %3453 = vmatpush3.msra.mxu0 %v4557_v40 }
 0x9be   : > { %3454 = vmatprep.subr.mxu0 %v2397_v2  ;;  %v1956_v30 = vpop.f32.mrf.mxu0 }
 0x9bf   : > { %3455 = vmatpush3.msra.mxu0 %v2397_v2  ;;  %3414 = vmatprep.mubr.msk.f32.mxu0 %vm471_vm1, %v1956_v30  ;;  %v2344_v39 = vpop.xlane.xlu0 %2343 }
 0x9c0   : > { %3456 = vmatprep.subr.mxu0 %v4569_v23  ;;  %3674 = vrcp.f32 %v2344_v39  ;;  %v3405_v9 = vpop.f32.mrf.mxu0  ;;  %3415 = vmatmul.mubr.msk.f32.gmra.mxu0 %vm471_vm1, %v3402_v29 }
 0x9c1   : > { %3457 = vmatpush3.msra.mxu0 %v4569_v23 }
 0x9c2   : > { %3458 = vmatprep.subr.mxu0 %v2393_v22  ;;  %v1966_v42 = vpop.f32.mrf.mxu0 }
 0x9c3   : > { %3459 = vmatpush3.msra.mxu0 %v2393_v22  ;;  %3417 = vmatprep.mubr.msk.f32.mxu0 %vm471_vm1, %v1966_v42  ;;  %v2353_v44 = vpop.xlane.xlu1 %2352  ;;  %v2350_v45 = vpop.xlane.xlu0 %2349 }
 0x9c4   : > { %3676 = vrcp.f32 %v2353_v44  ;;  %3418 = vmatmul.mubr.msk.f32.gmra.mxu0 %vm471_vm1, %v3405_v9 }
 0x9c5   : > { %3678 = vrcp.f32 %v2350_v45  ;;  %3464 = vmatprep.mubr.msk.f32.mxu0 %vm609_vm2, %v2371_v55 }
 0x9c7   : > { %v2359_v48 = vpop.xlane.xlu1 %2358  ;;  %v2356_v50 = vpop.xlane.xlu0 %2355 }
 0x9c8   : > { %3680 = vrcp.f32 %v2359_v48 }
 0x9c9   : > { %3682 = vrcp.f32 %v2356_v50 }
 0x9cb   : > { %v2362_v52 = vpop.xlane.xlu0 %2361  ;;  %v2389_v59 = vpop.permute.xlu1 %2388 }
 0x9cc   : > { %3684 = vrcp.f32 %v2362_v52 }
 0x9cd   : > { %v3675_v26 = vpop.eup %3674 }
 0x9ce   : > { %v2372_v27 = vmul.f32 %v3675_v26, %v4560_v49 }
 0x9cf   : > { %v2391_v56 = vpop.permute.xlu0 %2390 }
 0x9d0   : > { %2982 = vst.msk [vmem:[%s4049_s9 + $0xc8] sm:$0xff] %vm609_vm2, %v2372_v27  ;;  %3460 = vmatprep.subr.mxu0 %v2391_v56  ;;  %3496 = vmatprep.subr.mxu1 %v2391_v56 }
 0x9d1   : > { %v3677_v57 = vpop.eup %3676  ;;  %3461 = vmatpush3.msra.mxu0 %v2391_v56  ;;  %3504 = vmatpush3.msra.mxu1 %v2391_v56 }
 0x9d2   : > { %v3679_v61 = vpop.eup %3678  ;;  %3462 = vmatprep.subr.mxu0 %v2389_v59  ;;  %3497 = vmatprep.subr.mxu1 %v2389_v59  ;;  %v2375_v62 = vmul.f32 %v3677_v57, %v4567_v3  ;;  %v1509_v3 = vadd.f32 %v4595_v11, %v4335_v32  ;;  %v1529_v32 = vadd.f32 %v4612_v60, %v4343_v36 }
 0x9d3   : > { %3463 = vmatpush3.msra.mxu0 %v2389_v59  ;;  %3505 = vmatpush3.msra.mxu1 %v2389_v59  ;;  %v2374_v17 = vmul.f32 %v3679_v61, %v4565_v1  ;;  %v1514_v1 = vadd.f32 %v4593_v10, %v4333_v31 }
 0x9d4   : > { %3465 = vmatmul.mubr.msk.f32.vlgmr.msra.gmra.mxu0 %vm609_vm2, %v2372_v27  ;;  %2985 = vst.msk [vmem:[%s4049_s9 + $0xe0] sm:$0xff] %vm609_vm2, %v2375_v62  ;;  %3476 = vmatprep.subr.mxu0 %v2541_v53 }
 0x9d5   : > { %v3681_v46 = vpop.eup %3680  ;;  %3467 = vmatprep.mubr.msk.f32.mxu0 %vm609_vm2, %v4605_v28  ;;  %2984 = vst.msk [vmem:[%s4049_s9 + $0xd8] sm:$0xff] %vm609_vm2, %v2374_v17  ;;  %3477 = vmatpush3.msra.mxu0 %v2541_v53 }
 0x9d6   : > { %v3683_v63 = vpop.eup %3682  ;;  %v2377_v0 = vmul.f32 %v3681_v46, %v4579_v47  ;;  %v1519_v47 = vadd.f32 %v4602_v15, %v4339_v34  ;;  %v1539_v34 = vadd.f32 %v4616_v18, %v4347_v38 }
 0x9d7   : > { %v2376_v24 = vmul.f32 %v3683_v63, %v4576_v43 }
 0x9d8   : > { %3468 = vmatmul.mubr.msk.f32.gmra.mxu0 %vm609_vm2, %v2374_v17  ;;  %2987 = vst.msk [vmem:[%s4049_s9 + $0xf0] sm:$0xff] %vm609_vm2, %v2377_v0  ;;  %3473 = vmatprep.mubr.msk.f32.mxu1 %vm609_vm2, %v2377_v0 }
 0x9d9   : > { %v3685_v40 = vpop.eup %3684  ;;  %3470 = vmatprep.mubr.msk.f32.mxu0 %vm609_vm2, %v2375_v62  ;;  %2986 = vst.msk [vmem:[%s4049_s9 + $0xe8] sm:$0xff] %vm609_vm2, %v2376_v24 }
 0x9da   : > { %v2378_v49 = vmul.f32 %v3685_v40, %v4585_v8  ;;  %v1534_v8 = vadd.f32 %v4610_v58, %v4341_v35 }
 0x9dc   : > { %2988 = vst.msk [vmem:[%s4049_s9 + $0xf8] sm:$0xff] %vm609_vm2, %v2378_v49  ;;  %3471 = vmatmul.mubr.msk.f32.gmra.mxu0 %vm609_vm2, %v2376_v24  ;;  %3474 = vmatmul.mubr.msk.f32.vlgmr.msra.gmra.mxu1 %vm609_vm2, %v2378_v49  ;;  %s270_s9 = sand.u32 1, %s3738_s25  }
 0x9dd   : > { %s2815_s29 = sshll.u32 %s270_s9, 6  ;;  %s4709_s28 = scalar_lea.sflag [#allocation3], %s270_s9 }
 0x9de   : > { %s272_s14 = scalar_lea.vmem [#allocation2], %s2815_s29 }
 0x9df   : > { %s2721_s17 = sshll.u32 %s272_s14, 4  ;;  %s4703_s17 = int_to_ptr.vmem [resolvable:$true] %s2721_s17 }
 0x9e0   : > { %s3686_s23 = scalar_lea.vmem %s4703_s17, 1024  ;;  %p3693_p0 = scmp.lt.s32.totalorder %s4703_s17, %s3691_s22 }
 0x9e1   : > { %p3687_p11 = scmp.ne.s32.totalorder %s4703_s17, %s3686_s23  ;;  %p3694_p1 = scmp.lt.s32.totalorder %s3692_s16, %s3686_s23 }
 0x9e3   : > { %p3688_p12 = pnand %p3687_p11, %p3840_p5  ;;  %p3695_p2 = por %p3694_p1, %p3693_p0 }
 0x9e5   : > { %p3689_p13 = pneg %p3688_p12 }
 0x9e7   : > { %p3696_p3 = pnand %p3695_p2, %p3689_p13 }
 0xa78   : > { %v3410_v2 = vpop.f32.mrf.mxu0 }
 0xa79   : > { %v2106_v23 = vadd.f32 %v3410_v2, %v1514_v1 }
 0xa7a   : > { %v2066_v4 = vpop.f32.mrf.mxu0 }
 0xa7b   : > { %v2105_v43 = vadd.f32 %v2066_v4, %v1509_v3 }
 0xa7c   : > { %v3413_v22 = vpop.f32.mrf.mxu0 }
 0xa7d   : > { %v2108_v5 = vadd.f32 %v3413_v22, %v1524_v19 }
 0xa7e   : > { %v2076_v7 = vpop.f32.mrf.mxu0 }
 0xa7f   : > { %v2107_v31 = vadd.f32 %v2076_v7, %v1519_v47 }
 0xa80   : > { %v3416_v6 = vpop.f32.mrf.mxu0 }
 0xa81   : > { %v2110_v25 = vadd.f32 %v3416_v6, %v1534_v8 }
 0xa82   : > { %v2086_v51 = vpop.f32.mrf.mxu0 }
 0xa83   : > { %v2109_v10 = vadd.f32 %v2086_v51, %v1529_v32 }
 0xa84   : > { %v3419_v11 = vpop.f32.mrf.mxu0 }
 0xa85   : > { %v2112_v13 = vadd.f32 %v3419_v11, %v1544_v33 }
 0xa86   : > { %v2096_v54 = vpop.f32.mrf.mxu0 }
 0xa87   : > { %v2111_v55 = vadd.f32 %v2096_v54, %v1539_v34 }
 0xa94   : > { %v3466_v14 = vpop.f32.mrf.mxu0 }
 0xa96   : > { %v2502_v35 = vpop.f32.mrf.mxu0 }
 0xa97   : > { %3478 = vmatprep.mubr.msk.f32.mxu0 %vm471_vm1, %v2502_v35 }
 0xa98   : > { %v3469_v36 = vpop.f32.mrf.mxu0  ;;  %3479 = vmatmul.mubr.msk.f32.vlgmr.msra.gmra.mxu0 %vm471_vm1, %v3466_v14 }
 0xa9a   : > { %v2512_v15 = vpop.f32.mrf.mxu0 }
 0xa9b   : > { %3481 = vmatprep.mubr.msk.f32.mxu0 %vm471_vm1, %v2512_v15 }
 0xa9c   : > { %v3472_v37 = vpop.f32.mrf.mxu0  ;;  %v3475_v28 = vpop.f32.mrf.mxu1  ;;  %3482 = vmatmul.mubr.msk.f32.gmra.mxu0 %vm471_vm1, %v3469_v36 }
 0xa9e   : > { %v2522_v38 = vpop.f32.mrf.mxu0  ;;  %v2532_v58 = vpop.f32.mrf.mxu1 }
 0xa9f   : > { %3484 = vmatprep.mubr.msk.f32.mxu0 %vm471_vm1, %v2522_v38 }
 0xaa0   : > { %3485 = vmatmul.mubr.msk.f32.gmra.mxu0 %vm471_vm1, %v3472_v37 }
 0xaa1   : > { %3487 = vmatprep.mubr.msk.f32.mxu0 %vm471_vm1, %v2532_v58 }
 0xaa4   : > { %3488 = vmatmul.mubr.msk.f32.gmra.mxu0 %vm471_vm1, %v3475_v28 }
 0xb58   : > { %v3480_v60 = vpop.f32.mrf.mxu0 }
 0xb59   : > { %v2672_v18 = vadd.f32 %v3480_v60, %v2106_v23 }
 0xb5a   : > { %v2632_v20 = vpop.f32.mrf.mxu0 }
 0xb5b   : > { %v2687_v41 = vadd.f32 %v3005_v16, %v2672_v18  ;;  %v2671_v21 = vadd.f32 %v2632_v20, %v2105_v43 }
 0xb5c   : > { %v3483_v12 = vpop.f32.mrf.mxu0 }
 0xb5d   : > { %2695 = vst.msk [vmem:[%s272_s14 + $0x8] sm:$0xff] %vm309_vm0, %v2687_v41  ;;  %v2686_v29 = vadd.f32 %v3005_v16, %v2671_v21  ;;  %v2674_v30 = vadd.f32 %v3483_v12, %v2108_v5 }
 0xb5e   : > { %v2642_v39 = vpop.f32.mrf.mxu0 }
 0xb5f   : > { %2694 = vst.msk [vmem:[%s272_s14] sm:$0xff] %vm309_vm0, %v2686_v29  ;;  %v2689_v9 = vadd.f32 %v3005_v16, %v2674_v30  ;;  %v2673_v42 = vadd.f32 %v2642_v39, %v2107_v31 }
 0xb60   : > { %v3486_v44 = vpop.f32.mrf.mxu0 }
 0xb61   : > { %2697 = vst.msk [vmem:[%s272_s14 + $0x18] sm:$0xff] %vm309_vm0, %v2689_v9  ;;  %v2688_v45 = vadd.f32 %v3005_v16, %v2673_v42  ;;  %v2676_v48 = vadd.f32 %v3486_v44, %v2110_v25 }
 0xb62   : > { %v2652_v50 = vpop.f32.mrf.mxu0 }
 0xb63   : > { %2696 = vst.msk [vmem:[%s272_s14 + $0x10] sm:$0xff] %vm309_vm0, %v2688_v45  ;;  %v2691_v52 = vadd.f32 %v3005_v16, %v2676_v48  ;;  %v2675_v26 = vadd.f32 %v2652_v50, %v2109_v10 }
 0xb64   : > { %v3489_v27 = vpop.f32.mrf.mxu0 }
 0xb65   : > { %2699 = vst.msk [vmem:[%s272_s14 + $0x28] sm:$0xff] %vm309_vm0, %v2691_v52  ;;  %v2690_v56 = vadd.f32 %v3005_v16, %v2675_v26  ;;  %v2678_v57 = vadd.f32 %v3489_v27, %v2112_v13 }
 0xb66   : > { %v2662_v59 = vpop.f32.mrf.mxu0 }
 0xb67   : > { %2698 = vst.msk [vmem:[%s272_s14 + $0x20] sm:$0xff] %vm309_vm0, %v2690_v56  ;;  %v2693_v61 = vadd.f32 %v3005_v16, %v2678_v57  ;;  %v2677_v62 = vadd.f32 %v2662_v59, %v2111_v55 }
 0xb69   : > { %2701 = vst.msk [vmem:[%s272_s14 + $0x38] sm:$0xff] %vm309_vm0, %v2693_v61  ;;  %v2692_v17 = vadd.f32 %v3005_v16, %v2677_v62 }
 0xb6b   : > { %2700 = vst.msk [vmem:[%s272_s14 + $0x30] sm:$0xff] %vm309_vm0, %v2692_v17 }
 0xb6c   : > { %3699 = shalt.err (!%p3696_p3)
}
 0xb6d   : > { %s3700_s9 = scalar_lea.hbm %s4701_s20, 1024  ;;  %s3704_s13 = scalar_lea.hbm %s4755_s6, 2048 }
 0xb6e   : > { %p3701_p4 = scmp.ne.s32.totalorder %s4701_s20, %s3700_s9  ;;  %p3705_p9 = scmp.lt.s32.totalorder %s4701_s20, %s4755_s6 }
 0xb6f   : > { %p3706_p10 = scmp.lt.s32.totalorder %s3704_s13, %s3700_s9 }
 0xb70   : > { %p3702_p7 = pnand %p3701_p4, %p3840_p5 }
 0xb71   : > { %p3707_p11 = por %p3706_p10, %p3705_p9 }
 0xb72   : > { %p3703_p8 = pneg %p3702_p7 }
 0xb74   : > { %p3708_p12 = pnand %p3707_p11, %p3703_p8 }
 0xb76   : > { %3711 = shalt.err (!%p3708_p12)
}
 0xb77   : > { %s3760_s18 = smov 128   ;;  %s3761_s19 = smov 8  }
 0xb78   : > { %3506 = dma.vmem_to_hbm [thread:$0]  (%p3840_p5), %s4703_s17, 1024, %s4701_s20, %s4709_s28, %s3760_s18, %s3760_s18, %s3761_s19  }
 0xb79 PF: > { %p3512_p13 = scmp.ge.s32.totalorder %s3746_s27, 2  ;;  %s2739_s23 = sand.u32 1, %s3734_s24  }
 0xb7a   : > { %s2740_s21 = scalar_lea.sflag [#allocation3], %s2739_s23 }
 0xb7b   : > { %p3509_p0 = pnand %p3512_p13, %p3844_p6 }
 0xb7d   : > { %p3510_p1 = pneg %p3509_p0 }
 0xb7f   : > { %3729 = dma.done.wait (%p3510_p1), %s2740_s21, 1024  }
 0xb80   : > { %3731 = vsyncadd (%p3510_p1), %s2740_s21, 4294966272  ;;  %p18_p2 = scmp.ge.s32.totalorder %s3827_s30, 4   ;;  %s4759_s24 = smov %s3738_s25 }
 0xb81   : > { %s4760_s25 = smov %s3742_s26  ;;  %s4761_s26 = smov %s3838_s10 }
 0xb82   : > { %s4762_s27 = smov %s3827_s30  ;;  %20 = sbr.rel (!%p18_p2) target bundleno = 3 (0x3), region = 97 }
 0xb87   :  { %2753 = vsyncpa [#allocation3], 1 }
 0xb88   :  { %2755 = vsyncpa [#allocation3 + $0x1], 1 }

</bundles_post_ra>
